<compile_context>
chip_gen: v6e
topology: v6e:2x2x1
jax: 0.10.0
libtpu: 0.0.40
codegen_flags: <defaults>
</compile_context>

<pallas_src>
import functools

import jax
import jax.numpy as jnp
from jax import lax
from jax.experimental import pallas as pl
from jax.experimental.pallas import tpu as pltpu


def _round_up(x, m):
    return -(-x // m) * m


def _pick_tile(n, candidates):
    """Largest candidate tile that divides n; fall back to the full dimension."""
    for c in candidates:
        if c <= n and n % c == 0:
            return c
    return n


def _vmem_budget_and_cores():
    """Chip-generation-aware scoped-VMEM budget (+ a 2-TensorCore hint)."""
    try:
        phys = int(pltpu.get_tpu_info().vmem_capacity_bytes)
    except Exception:
        phys = 0
    if phys and phys <= 64 * 2 ** 20:        # v7x-class: 64 MiB VMEM, 2 TCs/chip
        return 48 * 2 ** 20, 2
    if phys >= 128 * 2 ** 20:                # v5e / v6e: 128 MiB VMEM, 1 TC
        return 100 * 2 ** 20, 1
    return 48 * 2 ** 20, 1                   # unknown: be conservative


# --------------------------------------------------------------------------- #
# Generic batched matmul + bias kernel (x-gate projection and vocab projection).
# bf16 MXU operands, f32 accumulation, f32 output.
# --------------------------------------------------------------------------- #
def _matmul_bias_kernel(x_ref, w_ref, b_ref, o_ref):
    x = x_ref[...]
    if x.dtype != w_ref.dtype:
        x = x.astype(w_ref.dtype)
    acc = jnp.dot(x, w_ref[...], preferred_element_type=jnp.float32)
    o_ref[...] = (acc + b_ref[...]).astype(o_ref.dtype)


def _matmul_bias(x, w_bf16, bias_f32, budget):
    """x: (M, K) bf16/f32, w: (K, N) bf16, bias: (1, N) f32  ->  (M, N) f32."""
    m, k = x.shape
    _, n = w_bf16.shape
    xb = jnp.dtype(x.dtype).itemsize
    tn = _pick_tile(n, (2048, 1024, 512, 256, 128))

    def est(tm_, tn_):
        # double-buffered inputs / bias / output
        return 2 * (tm_ * k * xb + k * tn_ * 2 + tn_ * 4 + tm_ * tn_ * 4)

    tm = m
    for c in (4096, 2048, 1024, 512, 256, 128, 64, 32, 16, 8):
        if c <= m and m % c == 0 and est(c, tn) <= budget:
            tm = c
            break

    return pl.pallas_call(
        _matmul_bias_kernel,
        out_shape=jax.ShapeDtypeStruct((m, n), jnp.float32),
        grid_spec=pltpu.PrefetchScalarGridSpec(
            num_scalar_prefetch=0,
            grid=(m // tm, n // tn),
            in_specs=[
                pl.BlockSpec((tm, k), lambda i, j: (i, 0)),
                pl.BlockSpec((k, tn), lambda i, j: (0, j)),
                pl.BlockSpec((1, tn), lambda i, j: (0, j)),
            ],
            out_specs=pl.BlockSpec((tm, tn), lambda i, j: (i, j)),
        ),
        compiler_params=pltpu.CompilerParams(
            dimension_semantics=("parallel", "parallel"),
            vmem_limit_bytes=int(budget),
        ),
    )(x, w_bf16, bias_f32)


# --------------------------------------------------------------------------- #
# Sequential GRU recurrence.  Grid = (batch_blocks, seq_chunks); one grid step
# processes t_chunk timesteps for one batch block.
# --------------------------------------------------------------------------- #
def _gru_recurrent_kernel(
    gx_ref,       # (t_chunk, b_blk, 3H)  precomputed x-gate projections (f32)
    h0_ref,       # (b_blk, H)            initial hidden state           (f32)
    wrzh_ref,     # (H, 2H)               fused recurrent weights r,z    (bf16)
    whh_ref,      # (H, H)                recurrent weight, candidate    (bf16)
    hseq_ref,     # (t_chunk, b_blk, H)   hidden states for this chunk   (bf16)
    hout_ref,     # (b_blk, H)            final hidden state             (f32)
    h_scratch,    # VMEM (b_blk, H)       hidden carried across chunks   (f32)
):
    c = pl.program_id(1)
    hidden = h_scratch.shape[-1]
    t_chunk = gx_ref.shape[0]

    @pl.when(c == 0)
    def _():
        h_scratch[...] = h0_ref[...]

    # Tiny recurrent weights; loaded once per grid step.
    wrzh = wrzh_ref[...]
    whh = whh_ref[...]

    def step(t, h):
        gx = gx_ref[t]                                        # (b_blk, 3H) f32
        gx_rz = gx[:, : 2 * hidden]
        gx_h = gx[:, 2 * hidden:]
        # r, z from one fused (B,H) @ (H,2H) MXU matmul; gate math stays f32.
        rz = jax.nn.sigmoid(
            gx_rz
            + jnp.dot(h.astype(jnp.bfloat16), wrzh, preferred_element_type=jnp.float32)
        )
        r = rz[:, :hidden]
        z = rz[:, hidden:]
        h_bar = jnp.tanh(
            gx_h
            + jnp.dot((h * r).astype(jnp.bfloat16), whh, preferred_element_type=jnp.float32)
        )
        # Intended GRU update (the original `torch.mul((1 - Zt, H_))` is a source bug).
        h_new = z * h + (1.0 - z) * h_bar
        hseq_ref[t] = h_new.astype(hseq_ref.dtype)            # bf16 writeback
        return h_new

    # Partial unroll: keeps LLO scheduling visibility without the vreg-spill cliff.
    h_final = lax.fori_loop(0, t_chunk, step, h_scratch[...], unroll=min(8, t_chunk))
    h_scratch[...] = h_final

    @pl.when(c == pl.num_programs(1) - 1)
    def _():
        hout_ref[...] = h_final


# --------------------------------------------------------------------------- #
# One-time parameter packing (hoisted out of the jitted forward).
# --------------------------------------------------------------------------- #
def prepare_gru_params(params):
    emb = params["embedding"]
    vocab, embed = emb.shape
    hdim = params["Wr"].shape[0]
    hpad = _round_up(hdim, 128)
    vpad = _round_up(vocab, 128)

    def pad_to(a, shape):
        return jnp.pad(a, [(0, s - d) for s, d in zip(shape, a.shape)])

    Wr, Wz, Wh = params["Wr"], params["Wz"], params["Wh"]
    # x-side weights fused to (E, 3*Hpad); zero-padded columns keep padded hidden == 0.
    wx = jnp.concatenate(
        [pad_to(Wr[:, :embed].T, (embed, hpad)),
         pad_to(Wz[:, :embed].T, (embed, hpad)),
         pad_to(Wh[:, :embed].T, (embed, hpad))], axis=1).astype(jnp.bfloat16)
    bx = jnp.concatenate(
        [pad_to(params["Br"].T, (1, hpad)),
         pad_to(params["Bz"].T, (1, hpad)),
         pad_to(params["Bh"].T, (1, hpad))], axis=1).astype(jnp.float32)
    # Recurrent weights: fused [Wrh | Wzh] (Hpad, 2*Hpad); Whh kept separate.
    wrzh = jnp.concatenate(
        [pad_to(Wr[:, embed:].T, (hpad, hpad)),
         pad_to(Wz[:, embed:].T, (hpad, hpad))], axis=1).astype(jnp.bfloat16)
    whh = pad_to(Wh[:, embed:].T, (hpad, hpad)).astype(jnp.bfloat16)
    wo = pad_to(params["W"].T, (hpad, vpad)).astype(jnp.bfloat16)    # (Hpad, Vpad)
    bo = pad_to(params["b"].T, (1, vpad)).astype(jnp.float32)        # (1, Vpad)

    budget, tc_hint = _vmem_budget_and_cores()

    return {
        "emb_bf16": emb.astype(jnp.bfloat16),
        "wx": wx, "bx": bx, "wrzh": wrzh, "whh": whh, "wo": wo, "bo": bo,
        "vocab": int(vocab), "embed": int(embed), "hidden": int(hdim),
        "hidden_pad": int(hpad), "vocab_pad": int(vpad),
        "vmem_budget": int(budget), "tc_hint": int(tc_hint),
    }


# --------------------------------------------------------------------------- #
# Forward pass wrapper.
# --------------------------------------------------------------------------- #
def gru_poem_forward(x_ids, packed, hidden=None, t_chunk=None):
    """x_ids: (seq_len, batch) int32.  Returns (output (seq*batch, vocab), Ht (hidden, batch))."""
    seq_len, batch = x_ids.shape
    vocab, embed, hdim = packed["vocab"], packed["embed"], packed["hidden"]
    hpad, vpad = packed["hidden_pad"], packed["vocab_pad"]
    budget = packed["vmem_budget"]

    b_pad = _round_up(max(batch, 8), 8)                       # sublane-dense batch

    # TODO(synk): embedding gather (nn.Embedding) stays as jnp.take glue; a manual Pallas
    # DMA-gather kernel is possible but not worthwhile for this op.
    embeds = jnp.take(packed["emb_bf16"], x_ids, axis=0)      # (S, B, E) bf16
    if b_pad != batch:
        embeds = jnp.pad(embeds, ((0, 0), (0, b_pad - batch), (0, 0)))

    if hidden is None:
        h0 = jnp.zeros((b_pad, hpad), jnp.float32)
    else:
        h0 = hidden.T.astype(jnp.float32)                     # PyTorch (hidden, batch) -> (B, H)
        h0 = jnp.pad(h0, ((0, b_pad - batch), (0, hpad - hdim)))

    # ---- sequence-chunk selection (budget-aware; amortizes ~0.35us/grid-step) ----
    if t_chunk is None:
        rec_budget = budget // 2
        t_chunk = 1
        for c in (128, 64, 32, 16, 8, 4, 2):
            if seq_len % c == 0:
                chunk_bytes = (
                    2 * c * b_pad * 3 * hpad * 4               # gx input blocks (x2 buffers)
                    + 2 * c * b_pad * hpad * 2                 # bf16 hseq output blocks
                    + 2 * (hpad * 2 * hpad + hpad * hpad) * 2  # bf16 recurrent weights
                    + 3 * b_pad * hpad * 4                     # h0 / hout / scratch
                )
                if chunk_bytes <= rec_budget:
                    t_chunk = c
                    break
    num_chunks = seq_len // t_chunk

    # Batch-parallel grid axis: only when the chip hints at 2 TensorCores (v7x-class).
    nb = 2 if (packed["tc_hint"] >= 2 and b_pad % 16 == 0) else 1
    b_blk = b_pad // nb

    # ---- (1) batched x-gate projection: one big (S*B, E) @ (E, 3H) matmul ----
    gx = _matmul_bias(embeds.reshape(seq_len * b_pad, embed),
                      packed["wx"], packed["bx"], budget)      # (S*B, 3Hpad) f32
    gx = gx.reshape(num_chunks, t_chunk, b_pad, 3 * hpad)      # free reshape (leading split)

    # ---- (2) sequential recurrence over (batch-block, seq-chunk) grid ----
    # TODO(synk): optional deeper fusion (compute the per-chunk x projection inside the
    # recurrent kernel to skip the gx HBM round-trip) left out; keep if gx shows in trace.
    hseq, h_final = pl.pallas_call(
        _gru_recurrent_kernel,
        out_shape=(
            jax.ShapeDtypeStruct((num_chunks, t_chunk, b_pad, hpad), jnp.bfloat16),
            jax.ShapeDtypeStruct((b_pad, hpad), jnp.float32),
        ),
        grid_spec=pltpu.PrefetchScalarGridSpec(
            num_scalar_prefetch=0,
            grid=(nb, num_chunks),
            in_specs=[
                pl.BlockSpec((None, t_chunk, b_blk, 3 * hpad), lambda b, c: (c, 0, b, 0)),
                pl.BlockSpec((b_blk, hpad), lambda b, c: (b, 0)),            # h0
                pl.BlockSpec((hpad, 2 * hpad), lambda b, c: (0, 0)),         # [Wrh|Wzh]
                pl.BlockSpec((hpad, hpad), lambda b, c: (0, 0)),             # Whh
            ],
            out_specs=[
                pl.BlockSpec((None, t_chunk, b_blk, hpad), lambda b, c: (c, 0, b, 0)),
                pl.BlockSpec((b_blk, hpad), lambda b, c: (b, 0)),            # final hidden
            ],
            scratch_shapes=[pltpu.VMEM((b_blk, hpad), jnp.float32)],
        ),
        compiler_params=pltpu.CompilerParams(
            dimension_semantics=("parallel", "arbitrary"),     # batch parallel, seq sequential
            vmem_limit_bytes=int(budget),
        ),
    )(gx, h0, packed["wrzh"], packed["whh"])

    # ---- (3) batched vocab projection: one big (S*B, H) @ (H, Vpad) matmul ----
    # TODO(synk): logits kept f32; emit bf16 here if the downstream loss tolerates it.
    logits_p = _matmul_bias(hseq.reshape(seq_len * b_pad, hpad),
                            packed["wo"], packed["bo"], budget)              # (S*B, Vpad) f32

    logits = logits_p.reshape(seq_len, b_pad, vpad)[:, :batch, :vocab]
    logits = logits.reshape(seq_len * batch, vocab)
    Ht = h_final[:batch, :hdim].T                              # PyTorch (hidden, batch) layout
    return logits, Ht


def init_params(key, vocab_size, embedding_dim=128, hidden_dim=128):
    """Deterministic init matching the __init__ shapes (torch.rand -> uniform[0,1))."""
    input_dim = hidden_dim + embedding_dim
    ks = jax.random.split(key, 9)
    u = lambda k, shape: jax.random.uniform(k, shape, jnp.float32)
    return {
        "embedding": jax.random.normal(ks[0], (vocab_size, embedding_dim), jnp.float32),
        "Wr": u(ks[1], (hidden_dim, input_dim)) * jnp.sqrt(2.0 / (input_dim + hidden_dim)),
        "Br": u(ks[2], (hidden_dim, 1)),
        "Wz": u(ks[3], (hidden_dim, input_dim)) * jnp.sqrt(2.0 / (hidden_dim + hidden_dim)),
        "Bz": u(ks[4], (hidden_dim, 1)),
        "Wh": u(ks[5], (hidden_dim, input_dim)) * jnp.sqrt(2.0 / (input_dim + hidden_dim)),
        "Bh": u(ks[6], (hidden_dim, 1)),
        "W": u(ks[7], (vocab_size, hidden_dim)) * jnp.sqrt(2.0 / (vocab_size + hidden_dim)),
        "b": u(ks[8], (vocab_size, 1)),
    }


def _reference_forward(x_ids, params, round_weights_to_bf16=False):
    """Pure-JAX reference mirroring the PyTorch loop (intended GRU semantics).

    With round_weights_to_bf16=True the matmul weights AND the embedding table are
    quantized exactly as the kernel path quantizes them, so the comparison isolates
    kernel logic from the intentional bf16 MXU precision.
    """
    rd = (lambda w: w.astype(jnp.bfloat16).astype(jnp.float32)) if round_weights_to_bf16 \
        else (lambda w: w)
    Wr, Wz, Wh, W = rd(params["Wr"]), rd(params["Wz"]), rd(params["Wh"]), rd(params["W"])
    Br, Bz, Bh, b = params["Br"], params["Bz"], params["Bh"], params["b"]
    emb = rd(params["embedding"])
    seq_len, batch = x_ids.shape
    hdim = params["Wr"].shape[0]
    Ht = jnp.zeros((hdim, batch), jnp.float32)
    embeds = jnp.take(emb, x_ids, axis=0)
    outs = []
    for i in range(seq_len):
        xT = embeds[i].T                                       # (embed, batch)
        x_h = jnp.concatenate([xT, Ht], axis=0)
        Rt = jax.nn.sigmoid(Wr @ x_h + Br)
        Zt = jax.nn.sigmoid(Wz @ x_h + Bz)
        x_h2 = jnp.concatenate([xT, Ht * Rt], axis=0)
        Hb = jnp.tanh(Wh @ x_h2 + Bh)
        Ht = Zt * Ht + (1.0 - Zt) * Hb
        y = (W @ Ht + b).T
        outs.append(y)
    return jnp.concatenate(outs, axis=0), Ht


if __name__ == "__main__":
    vocab_size, embedding_dim, hidden_dim = 64, 32, 32
    seq_len, batch = 8, 2

    key = jax.random.PRNGKey(0)
    k_param, k_x = jax.random.split(key)
    params = init_params(k_param, vocab_size, embedding_dim, hidden_dim)
    x_ids = jax.random.randint(k_x, (seq_len, batch), 0, vocab_size, dtype=jnp.int32)

    packed = prepare_gru_params(params)                        # one-time weight packing
    fwd = jax.jit(functools.partial(gru_poem_forward, packed=packed))
    out, Ht = fwd(x_ids)
    jax.block_until_ready((out, Ht))

    # Reference uses the same bf16-rounded weights/embeddings (kernel runs MXU matmuls in
    # bf16 with f32 accumulation); residual diffs are only activation rounding.
    ref_out, ref_Ht = _reference_forward(x_ids, params, round_weights_to_bf16=True)
    assert out.shape == (seq_len * batch, vocab_size)
    assert Ht.shape == (hidden_dim, batch)
    assert jnp.allclose(out, ref_out, atol=5e-2, rtol=5e-2), \
        float(jnp.max(jnp.abs(out - ref_out)))
    assert jnp.allclose(Ht, ref_Ht, atol=5e-2, rtol=5e-2), \
        float(jnp.max(jnp.abs(Ht - ref_Ht)))

    print("KERNEL_OK")
</pallas_src>

<mosaic_0001>
module attributes {stable_mosaic.version = 11 : i64} {
  func.func @_matmul_bias_kernel(%arg0: i32, %arg1: i32, %arg2: memref<64x32xbf16, #tpu.memory_space<vmem>>, %arg3: memref<32x128xbf16, #tpu.memory_space<vmem>>, %arg4: memref<1x128xf32, #tpu.memory_space<vmem>>, %arg5: memref<64x128xf32, #tpu.memory_space<vmem>>) attributes {dimension_semantics = [#tpu.dimension_semantics<parallel>, #tpu.dimension_semantics<parallel>], iteration_bounds = array<i64: 1, 3>, scalar_prefetch = 0 : i64, scratch_operands = 0 : i64, tpu.core_type = #tpu.core_type<tc>, window_params = [{transform_indices = @transform_0, window_bounds = array<i64: 64, 32>}, {transform_indices = @transform_1, window_bounds = array<i64: 32, 128>}, {transform_indices = @transform_2, window_bounds = array<i64: 1, 128>}, {transform_indices = @transform_3, window_bounds = array<i64: 64, 128>}]} {
    %c0 = arith.constant 0 : index
    %c0_0 = arith.constant 0 : index
    %0 = vector.load %arg2[%c0, %c0_0] : memref<64x32xbf16, #tpu.memory_space<vmem>>, vector<64x32xbf16>
    %c0_1 = arith.constant 0 : index
    %c0_2 = arith.constant 0 : index
    %1 = vector.load %arg3[%c0_1, %c0_2] : memref<32x128xbf16, #tpu.memory_space<vmem>>, vector<32x128xbf16>
    %cst = arith.constant dense<0.000000e+00> : vector<64x128xf32>
    %2 = tpu.matmul %0, %1, %cst {dimension_numbers = #tpu.dot_dimension_numbers<[1], [0], [0], [1], [0, 0, 1, 1], [], []>} : vector<64x32xbf16>, vector<32x128xbf16>, vector<64x128xf32> -> vector<64x128xf32>
    %c0_3 = arith.constant 0 : index
    %c0_4 = arith.constant 0 : index
    %3 = vector.load %arg4[%c0_3, %c0_4] : memref<1x128xf32, #tpu.memory_space<vmem>>, vector<1x128xf32>
    %4 = vector.broadcast %3 : vector<1x128xf32> to vector<64x128xf32>
    %5 = arith.addf %2, %4 : vector<64x128xf32>
    %c0_5 = arith.constant 0 : index
    %c0_6 = arith.constant 0 : index
    %6 = vector.load %arg5[%c0_5, %c0_6] : memref<64x128xf32, #tpu.memory_space<vmem>>, vector<64x128xf32>
    tpu.vector_store %arg5[%c0_5, %c0_6], %5 {strides = array<i32>} : memref<64x128xf32, #tpu.memory_space<vmem>>, vector<64x128xf32>,
    return
  }
  func.func @transform_0(%arg0: i32, %arg1: i32) -> (i32, i32) {
    %c0_i32 = arith.constant 0 : i32
    %c0_i32_0 = arith.constant 0 : i32
    return %arg0, %c0_i32 : i32, i32
  }
  func.func @transform_1(%arg0: i32, %arg1: i32) -> (i32, i32) {
    %c0_i32 = arith.constant 0 : i32
    %c0_i32_0 = arith.constant 0 : i32
    return %c0_i32, %arg1 : i32, i32
  }
  func.func @transform_2(%arg0: i32, %arg1: i32) -> (i32, i32) {
    %c0_i32 = arith.constant 0 : i32
    %c0_i32_0 = arith.constant 0 : i32
    return %c0_i32, %arg1 : i32, i32
  }
  func.func @transform_3(%arg0: i32, %arg1: i32) -> (i32, i32) {
    %c0_i32 = arith.constant 0 : i32
    return %arg0, %arg1 : i32, i32
  }
}

module attributes {stable_mosaic.version = 11 : i64} {
  func.func @_gru_recurrent_kernel(%arg0: i32, %arg1: i32, %arg2: memref<1x8x8x384xf32, #tpu.memory_space<vmem>>, %arg3: memref<8x128xf32, #tpu.memory_space<vmem>>, %arg4: memref<128x256xbf16, #tpu.memory_space<vmem>>, %arg5: memref<128x128xbf16, #tpu.memory_space<vmem>>, %arg6: memref<1x8x8x128xbf16, #tpu.memory_space<vmem>>, %arg7: memref<8x128xf32, #tpu.memory_space<vmem>>, %arg8: memref<8x128xf32, #tpu.memory_space<vmem>>) attributes {dimension_semantics = [#tpu.dimension_semantics<parallel>, #tpu.dimension_semantics<arbitrary>], iteration_bounds = array<i64: 1, 1>, scalar_prefetch = 0 : i64, scratch_operands = 1 : i64, tpu.core_type = #tpu.core_type<tc>, window_params = [{transform_indices = @transform_0, window_bounds = array<i64: 1, 8, 8, 384>}, {transform_indices = @transform_1, window_bounds = array<i64: 8, 128>}, {pipeline_mode = #tpu.pipeline_mode<synchronous>, transform_indices = @transform_2, window_bounds = array<i64: 128, 256>}, {pipeline_mode = #tpu.pipeline_mode<synchronous>, transform_indices = @transform_3, window_bounds = array<i64: 128, 128>}, {transform_indices = @transform_4, window_bounds = array<i64: 1, 8, 8, 128>}, {transform_indices = @transform_5, window_bounds = array<i64: 8, 128>}]} {
    %c0_i32 = arith.constant 0 : i32
    %0 = arith.cmpi eq, %arg1, %c0_i32 : i32
    %1 = arith.extui %0 : i1 to i32
    %c0_i32_0 = arith.constant 0 : i32
    %2 = arith.cmpi ne, %1, %c0_i32_0 : i32
    scf.if %2 {
      %c0_90 = arith.constant 0 : index
      %c0_91 = arith.constant 0 : index
      %250 = vector.load %arg3[%c0_90, %c0_91] : memref<8x128xf32, #tpu.memory_space<vmem>>, vector<8x128xf32>
      %c0_92 = arith.constant 0 : index
      %c0_93 = arith.constant 0 : index
      %251 = vector.load %arg8[%c0_92, %c0_93] : memref<8x128xf32, #tpu.memory_space<vmem>>, vector<8x128xf32>
      tpu.vector_store %arg8[%c0_92, %c0_93], %250 {strides = array<i32>} : memref<8x128xf32, #tpu.memory_space<vmem>>, vector<8x128xf32>,
    } else {
    }
    %c0 = arith.constant 0 : index
    %c0_1 = arith.constant 0 : index
    %3 = vector.load %arg4[%c0, %c0_1] : memref<128x256xbf16, #tpu.memory_space<vmem>>, vector<128x256xbf16>
    %c0_2 = arith.constant 0 : index
    %c0_3 = arith.constant 0 : index
    %4 = vector.load %arg5[%c0_2, %c0_3] : memref<128x128xbf16, #tpu.memory_space<vmem>>, vector<128x128xbf16>
    %c0_4 = arith.constant 0 : index
    %c0_5 = arith.constant 0 : index
    %5 = vector.load %arg8[%c0_4, %c0_5] : memref<8x128xf32, #tpu.memory_space<vmem>>, vector<8x128xf32>
    %c0_i32_6 = arith.constant 0 : i32
    %c0_7 = arith.constant 0 : index
    %6 = arith.index_cast %c0_i32_6 : i32 to index
    %c0_8 = arith.constant 0 : index
    %c0_9 = arith.constant 0 : index
    %7 = vector.load %arg2[%c0_7, %6, %c0_8, %c0_9] : memref<1x8x8x384xf32, #tpu.memory_space<vmem>>, vector<1x1x8x384xf32>
    %8 = vector.shape_cast %7 : vector<1x1x8x384xf32> to vector<8x384xf32>
    %9 = vector.extract_strided_slice %8 {offsets = [0, 0], sizes = [8, 256], strides = [1, 1]} : vector<8x384xf32> to vector<8x256xf32>
    %10 = vector.extract_strided_slice %8 {offsets = [0, 256], sizes = [8, 128], strides = [1, 1]} : vector<8x384xf32> to vector<8x128xf32>
    %11 = arith.truncf %5 : vector<8x128xf32> to vector<8x128xbf16>
    %cst = arith.constant dense<0.000000e+00> : vector<8x256xf32>
    %12 = tpu.matmul %11, %3, %cst {dimension_numbers = #tpu.dot_dimension_numbers<[1], [0], [0], [1], [0, 0, 1, 1], [], []>} : vector<8x128xbf16>, vector<128x256xbf16>, vector<8x256xf32> -> vector<8x256xf32>
    %13 = arith.addf %9, %12 : vector<8x256xf32>
    %14 = arith.negf %13 : vector<8x256xf32>
    %15 = math.exp %14 : vector<8x256xf32>
    %cst_10 = arith.constant 1.000000e+00 : f32
    %16 = vector.broadcast %cst_10 : f32 to vector<8x256xf32>
    %17 = arith.addf %16, %15 : vector<8x256xf32>
    %18 = arith.divf %16, %17 : vector<8x256xf32>
    %19 = vector.extract_strided_slice %18 {offsets = [0, 0], sizes = [8, 128], strides = [1, 1]} : vector<8x256xf32> to vector<8x128xf32>
    %20 = vector.extract_strided_slice %18 {offsets = [0, 128], sizes = [8, 128], strides = [1, 1]} : vector<8x256xf32> to vector<8x128xf32>
    %21 = arith.mulf %5, %19 : vector<8x128xf32>
    %22 = arith.truncf %21 : vector<8x128xf32> to vector<8x128xbf16>
    %cst_11 = arith.constant dense<0.000000e+00> : vector<8x128xf32>
    %23 = tpu.matmul %22, %4, %cst_11 {dimension_numbers = #tpu.dot_dimension_numbers<[1], [0], [0], [1], [0, 0, 1, 1], [], []>} : vector<8x128xbf16>, vector<128x128xbf16>, vector<8x128xf32> -> vector<8x128xf32>
    %24 = arith.addf %10, %23 : vector<8x128xf32>
    %25 = math.tanh %24 : vector<8x128xf32>
    %26 = arith.mulf %20, %5 : vector<8x128xf32>
    %cst_12 = arith.constant 1.000000e+00 : f32
    %27 = vector.broadcast %cst_12 : f32 to vector<8x128xf32>
    %28 = arith.subf %27, %20 : vector<8x128xf32>
    %29 = arith.mulf %28, %25 : vector<8x128xf32>
    %30 = arith.addf %26, %29 : vector<8x128xf32>
    %31 = arith.truncf %30 : vector<8x128xf32> to vector<8x128xbf16>
    %c0_13 = arith.constant 0 : index
    %32 = arith.index_cast %c0_i32_6 : i32 to index
    %c0_14 = arith.constant 0 : index
    %c0_15 = arith.constant 0 : index
    %33 = vector.load %arg6[%c0_13, %32, %c0_14, %c0_15] : memref<1x8x8x128xbf16, #tpu.memory_space<vmem>>, vector<1x1x8x128xbf16>
    %34 = vector.shape_cast %33 : vector<1x1x8x128xbf16> to vector<8x128xbf16>
    %35 = vector.shape_cast %31 : vector<8x128xbf16> to vector<1x1x8x128xbf16>
    tpu.vector_store %arg6[%c0_13, %32, %c0_14, %c0_15], %35 {strides = array<i32>} : memref<1x8x8x128xbf16, #tpu.memory_space<vmem>>, vector<1x1x8x128xbf16>,
    %c1_i32 = arith.constant 1 : i32
    %c0_16 = arith.constant 0 : index
    %36 = arith.index_cast %c1_i32 : i32 to index
    %c0_17 = arith.constant 0 : index
    %c0_18 = arith.constant 0 : index
    %37 = vector.load %arg2[%c0_16, %36, %c0_17, %c0_18] : memref<1x8x8x384xf32, #tpu.memory_space<vmem>>, vector<1x1x8x384xf32>
    %38 = vector.shape_cast %37 : vector<1x1x8x384xf32> to vector<8x384xf32>
    %39 = vector.extract_strided_slice %38 {offsets = [0, 0], sizes = [8, 256], strides = [1, 1]} : vector<8x384xf32> to vector<8x256xf32>
    %40 = vector.extract_strided_slice %38 {offsets = [0, 256], sizes = [8, 128], strides = [1, 1]} : vector<8x384xf32> to vector<8x128xf32>
    %41 = arith.truncf %30 : vector<8x128xf32> to vector<8x128xbf16>
    %cst_19 = arith.constant dense<0.000000e+00> : vector<8x256xf32>
    %42 = tpu.matmul %41, %3, %cst_19 {dimension_numbers = #tpu.dot_dimension_numbers<[1], [0], [0], [1], [0, 0, 1, 1], [], []>} : vector<8x128xbf16>, vector<128x256xbf16>, vector<8x256xf32> -> vector<8x256xf32>
    %43 = arith.addf %39, %42 : vector<8x256xf32>
    %44 = arith.negf %43 : vector<8x256xf32>
    %45 = math.exp %44 : vector<8x256xf32>
    %cst_20 = arith.constant 1.000000e+00 : f32
    %46 = vector.broadcast %cst_20 : f32 to vector<8x256xf32>
    %47 = arith.addf %46, %45 : vector<8x256xf32>
    %48 = arith.divf %46, %47 : vector<8x256xf32>
    %49 = vector.extract_strided_slice %48 {offsets = [0, 0], sizes = [8, 128], strides = [1, 1]} : vector<8x256xf32> to vector<8x128xf32>
    %50 = vector.extract_strided_slice %48 {offsets = [0, 128], sizes = [8, 128], strides = [1, 1]} : vector<8x256xf32> to vector<8x128xf32>
    %51 = arith.mulf %30, %49 : vector<8x128xf32>
    %52 = arith.truncf %51 : vector<8x128xf32> to vector<8x128xbf16>
    %cst_21 = arith.constant dense<0.000000e+00> : vector<8x128xf32>
    %53 = tpu.matmul %52, %4, %cst_21 {dimension_numbers = #tpu.dot_dimension_numbers<[1], [0], [0], [1], [0, 0, 1, 1], [], []>} : vector<8x128xbf16>, vector<128x128xbf16>, vector<8x128xf32> -> vector<8x128xf32>
    %54 = arith.addf %40, %53 : vector<8x128xf32>
    %55 = math.tanh %54 : vector<8x128xf32>
    %56 = arith.mulf %50, %30 : vector<8x128xf32>
    %cst_22 = arith.constant 1.000000e+00 : f32
    %57 = vector.broadcast %cst_22 : f32 to vector<8x128xf32>
    %58 = arith.subf %57, %50 : vector<8x128xf32>
    %59 = arith.mulf %58, %55 : vector<8x128xf32>
    %60 = arith.addf %56, %59 : vector<8x128xf32>
    %61 = arith.truncf %60 : vector<8x128xf32> to vector<8x128xbf16>
    %c0_23 = arith.constant 0 : index
    %62 = arith.index_cast %c1_i32 : i32 to index
    %c0_24 = arith.constant 0 : index
    %c0_25 = arith.constant 0 : index
    %63 = vector.load %arg6[%c0_23, %62, %c0_24, %c0_25] : memref<1x8x8x128xbf16, #tpu.memory_space<vmem>>, vector<1x1x8x128xbf16>
    %64 = vector.shape_cast %63 : vector<1x1x8x128xbf16> to vector<8x128xbf16>
    %65 = vector.shape_cast %61 : vector<8x128xbf16> to vector<1x1x8x128xbf16>
    tpu.vector_store %arg6[%c0_23, %62, %c0_24, %c0_25], %65 {strides = array<i32>} : memref<1x8x8x128xbf16, #tpu.memory_space<vmem>>, vector<1x1x8x128xbf16>,
    %c2_i32 = arith.constant 2 : i32
    %c0_26 = arith.constant 0 : index
    %66 = arith.index_cast %c2_i32 : i32 to index
    %c0_27 = arith.constant 0 : index
    %c0_28 = arith.constant 0 : index
    %67 = vector.load %arg2[%c0_26, %66, %c0_27, %c0_28] : memref<1x8x8x384xf32, #tpu.memory_space<vmem>>, vector<1x1x8x384xf32>
    %68 = vector.shape_cast %67 : vector<1x1x8x384xf32> to vector<8x384xf32>
    %69 = vector.extract_strided_slice %68 {offsets = [0, 0], sizes = [8, 256], strides = [1, 1]} : vector<8x384xf32> to vector<8x256xf32>
    %70 = vector.extract_strided_slice %68 {offsets = [0, 256], sizes = [8, 128], strides = [1, 1]} : vector<8x384xf32> to vector<8x128xf32>
    %71 = arith.truncf %60 : vector<8x128xf32> to vector<8x128xbf16>
    %cst_29 = arith.constant dense<0.000000e+00> : vector<8x256xf32>
    %72 = tpu.matmul %71, %3, %cst_29 {dimension_numbers = #tpu.dot_dimension_numbers<[1], [0], [0], [1], [0, 0, 1, 1], [], []>} : vector<8x128xbf16>, vector<128x256xbf16>, vector<8x256xf32> -> vector<8x256xf32>
    %73 = arith.addf %69, %72 : vector<8x256xf32>
    %74 = arith.negf %73 : vector<8x256xf32>
    %75 = math.exp %74 : vector<8x256xf32>
    %cst_30 = arith.constant 1.000000e+00 : f32
    %76 = vector.broadcast %cst_30 : f32 to vector<8x256xf32>
    %77 = arith.addf %76, %75 : vector<8x256xf32>
    %78 = arith.divf %76, %77 : vector<8x256xf32>
    %79 = vector.extract_strided_slice %78 {offsets = [0, 0], sizes = [8, 128], strides = [1, 1]} : vector<8x256xf32> to vector<8x128xf32>
    %80 = vector.extract_strided_slice %78 {offsets = [0, 128], sizes = [8, 128], strides = [1, 1]} : vector<8x256xf32> to vector<8x128xf32>
    %81 = arith.mulf %60, %79 : vector<8x128xf32>
    %82 = arith.truncf %81 : vector<8x128xf32> to vector<8x128xbf16>
    %cst_31 = arith.constant dense<0.000000e+00> : vector<8x128xf32>
    %83 = tpu.matmul %82, %4, %cst_31 {dimension_numbers = #tpu.dot_dimension_numbers<[1], [0], [0], [1], [0, 0, 1, 1], [], []>} : vector<8x128xbf16>, vector<128x128xbf16>, vector<8x128xf32> -> vector<8x128xf32>
    %84 = arith.addf %70, %83 : vector<8x128xf32>
    %85 = math.tanh %84 : vector<8x128xf32>
    %86 = arith.mulf %80, %60 : vector<8x128xf32>
    %cst_32 = arith.constant 1.000000e+00 : f32
    %87 = vector.broadcast %cst_32 : f32 to vector<8x128xf32>
    %88 = arith.subf %87, %80 : vector<8x128xf32>
    %89 = arith.mulf %88, %85 : vector<8x128xf32>
    %90 = arith.addf %86, %89 : vector<8x128xf32>
    %91 = arith.truncf %90 : vector<8x128xf32> to vector<8x128xbf16>
    %c0_33 = arith.constant 0 : index
    %92 = arith.index_cast %c2_i32 : i32 to index
    %c0_34 = arith.constant 0 : index
    %c0_35 = arith.constant 0 : index
    %93 = vector.load %arg6[%c0_33, %92, %c0_34, %c0_35] : memref<1x8x8x128xbf16, #tpu.memory_space<vmem>>, vector<1x1x8x128xbf16>
    %94 = vector.shape_cast %93 : vector<1x1x8x128xbf16> to vector<8x128xbf16>
    %95 = vector.shape_cast %91 : vector<8x128xbf16> to vector<1x1x8x128xbf16>
    tpu.vector_store %arg6[%c0_33, %92, %c0_34, %c0_35], %95 {strides = array<i32>} : memref<1x8x8x128xbf16, #tpu.memory_space<vmem>>, vector<1x1x8x128xbf16>,
    %c3_i32 = arith.constant 3 : i32
    %c0_36 = arith.constant 0 : index
    %96 = arith.index_cast %c3_i32 : i32 to index
    %c0_37 = arith.constant 0 : index
    %c0_38 = arith.constant 0 : index
    %97 = vector.load %arg2[%c0_36, %96, %c0_37, %c0_38] : memref<1x8x8x384xf32, #tpu.memory_space<vmem>>, vector<1x1x8x384xf32>
    %98 = vector.shape_cast %97 : vector<1x1x8x384xf32> to vector<8x384xf32>
    %99 = vector.extract_strided_slice %98 {offsets = [0, 0], sizes = [8, 256], strides = [1, 1]} : vector<8x384xf32> to vector<8x256xf32>
    %100 = vector.extract_strided_slice %98 {offsets = [0, 256], sizes = [8, 128], strides = [1, 1]} : vector<8x384xf32> to vector<8x128xf32>
    %101 = arith.truncf %90 : vector<8x128xf32> to vector<8x128xbf16>
    %cst_39 = arith.constant dense<0.000000e+00> : vector<8x256xf32>
    %102 = tpu.matmul %101, %3, %cst_39 {dimension_numbers = #tpu.dot_dimension_numbers<[1], [0], [0], [1], [0, 0, 1, 1], [], []>} : vector<8x128xbf16>, vector<128x256xbf16>, vector<8x256xf32> -> vector<8x256xf32>
    %103 = arith.addf %99, %102 : vector<8x256xf32>
    %104 = arith.negf %103 : vector<8x256xf32>
    %105 = math.exp %104 : vector<8x256xf32>
    %cst_40 = arith.constant 1.000000e+00 : f32
    %106 = vector.broadcast %cst_40 : f32 to vector<8x256xf32>
    %107 = arith.addf %106, %105 : vector<8x256xf32>
    %108 = arith.divf %106, %107 : vector<8x256xf32>
    %109 = vector.extract_strided_slice %108 {offsets = [0, 0], sizes = [8, 128], strides = [1, 1]} : vector<8x256xf32> to vector<8x128xf32>
    %110 = vector.extract_strided_slice %108 {offsets = [0, 128], sizes = [8, 128], strides = [1, 1]} : vector<8x256xf32> to vector<8x128xf32>
    %111 = arith.mulf %90, %109 : vector<8x128xf32>
    %112 = arith.truncf %111 : vector<8x128xf32> to vector<8x128xbf16>
    %cst_41 = arith.constant dense<0.000000e+00> : vector<8x128xf32>
    %113 = tpu.matmul %112, %4, %cst_41 {dimension_numbers = #tpu.dot_dimension_numbers<[1], [0], [0], [1], [0, 0, 1, 1], [], []>} : vector<8x128xbf16>, vector<128x128xbf16>, vector<8x128xf32> -> vector<8x128xf32>
    %114 = arith.addf %100, %113 : vector<8x128xf32>
    %115 = math.tanh %114 : vector<8x128xf32>
    %116 = arith.mulf %110, %90 : vector<8x128xf32>
    %cst_42 = arith.constant 1.000000e+00 : f32
    %117 = vector.broadcast %cst_42 : f32 to vector<8x128xf32>
    %118 = arith.subf %117, %110 : vector<8x128xf32>
    %119 = arith.mulf %118, %115 : vector<8x128xf32>
    %120 = arith.addf %116, %119 : vector<8x128xf32>
    %121 = arith.truncf %120 : vector<8x128xf32> to vector<8x128xbf16>
    %c0_43 = arith.constant 0 : index
    %122 = arith.index_cast %c3_i32 : i32 to index
    %c0_44 = arith.constant 0 : index
    %c0_45 = arith.constant 0 : index
    %123 = vector.load %arg6[%c0_43, %122, %c0_44, %c0_45] : memref<1x8x8x128xbf16, #tpu.memory_space<vmem>>, vector<1x1x8x128xbf16>
    %124 = vector.shape_cast %123 : vector<1x1x8x128xbf16> to vector<8x128xbf16>
    %125 = vector.shape_cast %121 : vector<8x128xbf16> to vector<1x1x8x128xbf16>
    tpu.vector_store %arg6[%c0_43, %122, %c0_44, %c0_45], %125 {strides = array<i32>} : memref<1x8x8x128xbf16, #tpu.memory_space<vmem>>, vector<1x1x8x128xbf16>,
    %c4_i32 = arith.constant 4 : i32
    %c0_46 = arith.constant 0 : index
    %126 = arith.index_cast %c4_i32 : i32 to index
    %c0_47 = arith.constant 0 : index
    %c0_48 = arith.constant 0 : index
    %127 = vector.load %arg2[%c0_46, %126, %c0_47, %c0_48] : memref<1x8x8x384xf32, #tpu.memory_space<vmem>>, vector<1x1x8x384xf32>
    %128 = vector.shape_cast %127 : vector<1x1x8x384xf32> to vector<8x384xf32>
    %129 = vector.extract_strided_slice %128 {offsets = [0, 0], sizes = [8, 256], strides = [1, 1]} : vector<8x384xf32> to vector<8x256xf32>
    %130 = vector.extract_strided_slice %128 {offsets = [0, 256], sizes = [8, 128], strides = [1, 1]} : vector<8x384xf32> to vector<8x128xf32>
    %131 = arith.truncf %120 : vector<8x128xf32> to vector<8x128xbf16>
    %cst_49 = arith.constant dense<0.000000e+00> : vector<8x256xf32>
    %132 = tpu.matmul %131, %3, %cst_49 {dimension_numbers = #tpu.dot_dimension_numbers<[1], [0], [0], [1], [0, 0, 1, 1], [], []>} : vector<8x128xbf16>, vector<128x256xbf16>, vector<8x256xf32> -> vector<8x256xf32>
    %133 = arith.addf %129, %132 : vector<8x256xf32>
    %134 = arith.negf %133 : vector<8x256xf32>
    %135 = math.exp %134 : vector<8x256xf32>
    %cst_50 = arith.constant 1.000000e+00 : f32
    %136 = vector.broadcast %cst_50 : f32 to vector<8x256xf32>
    %137 = arith.addf %136, %135 : vector<8x256xf32>
    %138 = arith.divf %136, %137 : vector<8x256xf32>
    %139 = vector.extract_strided_slice %138 {offsets = [0, 0], sizes = [8, 128], strides = [1, 1]} : vector<8x256xf32> to vector<8x128xf32>
    %140 = vector.extract_strided_slice %138 {offsets = [0, 128], sizes = [8, 128], strides = [1, 1]} : vector<8x256xf32> to vector<8x128xf32>
    %141 = arith.mulf %120, %139 : vector<8x128xf32>
    %142 = arith.truncf %141 : vector<8x128xf32> to vector<8x128xbf16>
    %cst_51 = arith.constant dense<0.000000e+00> : vector<8x128xf32>
    %143 = tpu.matmul %142, %4, %cst_51 {dimension_numbers = #tpu.dot_dimension_numbers<[1], [0], [0], [1], [0, 0, 1, 1], [], []>} : vector<8x128xbf16>, vector<128x128xbf16>, vector<8x128xf32> -> vector<8x128xf32>
    %144 = arith.addf %130, %143 : vector<8x128xf32>
    %145 = math.tanh %144 : vector<8x128xf32>
    %146 = arith.mulf %140, %120 : vector<8x128xf32>
    %cst_52 = arith.constant 1.000000e+00 : f32
    %147 = vector.broadcast %cst_52 : f32 to vector<8x128xf32>
    %148 = arith.subf %147, %140 : vector<8x128xf32>
    %149 = arith.mulf %148, %145 : vector<8x128xf32>
    %150 = arith.addf %146, %149 : vector<8x128xf32>
    %151 = arith.truncf %150 : vector<8x128xf32> to vector<8x128xbf16>
    %c0_53 = arith.constant 0 : index
    %152 = arith.index_cast %c4_i32 : i32 to index
    %c0_54 = arith.constant 0 : index
    %c0_55 = arith.constant 0 : index
    %153 = vector.load %arg6[%c0_53, %152, %c0_54, %c0_55] : memref<1x8x8x128xbf16, #tpu.memory_space<vmem>>, vector<1x1x8x128xbf16>
    %154 = vector.shape_cast %153 : vector<1x1x8x128xbf16> to vector<8x128xbf16>
    %155 = vector.shape_cast %151 : vector<8x128xbf16> to vector<1x1x8x128xbf16>
    tpu.vector_store %arg6[%c0_53, %152, %c0_54, %c0_55], %155 {strides = array<i32>} : memref<1x8x8x128xbf16, #tpu.memory_space<vmem>>, vector<1x1x8x128xbf16>,
    %c5_i32 = arith.constant 5 : i32
    %c0_56 = arith.constant 0 : index
    %156 = arith.index_cast %c5_i32 : i32 to index
    %c0_57 = arith.constant 0 : index
    %c0_58 = arith.constant 0 : index
    %157 = vector.load %arg2[%c0_56, %156, %c0_57, %c0_58] : memref<1x8x8x384xf32, #tpu.memory_space<vmem>>, vector<1x1x8x384xf32>
    %158 = vector.shape_cast %157 : vector<1x1x8x384xf32> to vector<8x384xf32>
    %159 = vector.extract_strided_slice %158 {offsets = [0, 0], sizes = [8, 256], strides = [1, 1]} : vector<8x384xf32> to vector<8x256xf32>
    %160 = vector.extract_strided_slice %158 {offsets = [0, 256], sizes = [8, 128], strides = [1, 1]} : vector<8x384xf32> to vector<8x128xf32>
    %161 = arith.truncf %150 : vector<8x128xf32> to vector<8x128xbf16>
    %cst_59 = arith.constant dense<0.000000e+00> : vector<8x256xf32>
    %162 = tpu.matmul %161, %3, %cst_59 {dimension_numbers = #tpu.dot_dimension_numbers<[1], [0], [0], [1], [0, 0, 1, 1], [], []>} : vector<8x128xbf16>, vector<128x256xbf16>, vector<8x256xf32> -> vector<8x256xf32>
    %163 = arith.addf %159, %162 : vector<8x256xf32>
    %164 = arith.negf %163 : vector<8x256xf32>
    %165 = math.exp %164 : vector<8x256xf32>
    %cst_60 = arith.constant 1.000000e+00 : f32
    %166 = vector.broadcast %cst_60 : f32 to vector<8x256xf32>
    %167 = arith.addf %166, %165 : vector<8x256xf32>
    %168 = arith.divf %166, %167 : vector<8x256xf32>
    %169 = vector.extract_strided_slice %168 {offsets = [0, 0], sizes = [8, 128], strides = [1, 1]} : vector<8x256xf32> to vector<8x128xf32>
    %170 = vector.extract_strided_slice %168 {offsets = [0, 128], sizes = [8, 128], strides = [1, 1]} : vector<8x256xf32> to vector<8x128xf32>
    %171 = arith.mulf %150, %169 : vector<8x128xf32>
    %172 = arith.truncf %171 : vector<8x128xf32> to vector<8x128xbf16>
    %cst_61 = arith.constant dense<0.000000e+00> : vector<8x128xf32>
    %173 = tpu.matmul %172, %4, %cst_61 {dimension_numbers = #tpu.dot_dimension_numbers<[1], [0], [0], [1], [0, 0, 1, 1], [], []>} : vector<8x128xbf16>, vector<128x128xbf16>, vector<8x128xf32> -> vector<8x128xf32>
    %174 = arith.addf %160, %173 : vector<8x128xf32>
    %175 = math.tanh %174 : vector<8x128xf32>
    %176 = arith.mulf %170, %150 : vector<8x128xf32>
    %cst_62 = arith.constant 1.000000e+00 : f32
    %177 = vector.broadcast %cst_62 : f32 to vector<8x128xf32>
    %178 = arith.subf %177, %170 : vector<8x128xf32>
    %179 = arith.mulf %178, %175 : vector<8x128xf32>
    %180 = arith.addf %176, %179 : vector<8x128xf32>
    %181 = arith.truncf %180 : vector<8x128xf32> to vector<8x128xbf16>
    %c0_63 = arith.constant 0 : index
    %182 = arith.index_cast %c5_i32 : i32 to index
    %c0_64 = arith.constant 0 : index
    %c0_65 = arith.constant 0 : index
    %183 = vector.load %arg6[%c0_63, %182, %c0_64, %c0_65] : memref<1x8x8x128xbf16, #tpu.memory_space<vmem>>, vector<1x1x8x128xbf16>
    %184 = vector.shape_cast %183 : vector<1x1x8x128xbf16> to vector<8x128xbf16>
    %185 = vector.shape_cast %181 : vector<8x128xbf16> to vector<1x1x8x128xbf16>
    tpu.vector_store %arg6[%c0_63, %182, %c0_64, %c0_65], %185 {strides = array<i32>} : memref<1x8x8x128xbf16, #tpu.memory_space<vmem>>, vector<1x1x8x128xbf16>,
    %c6_i32 = arith.constant 6 : i32
    %c0_66 = arith.constant 0 : index
    %186 = arith.index_cast %c6_i32 : i32 to index
    %c0_67 = arith.constant 0 : index
    %c0_68 = arith.constant 0 : index
    %187 = vector.load %arg2[%c0_66, %186, %c0_67, %c0_68] : memref<1x8x8x384xf32, #tpu.memory_space<vmem>>, vector<1x1x8x384xf32>
    %188 = vector.shape_cast %187 : vector<1x1x8x384xf32> to vector<8x384xf32>
    %189 = vector.extract_strided_slice %188 {offsets = [0, 0], sizes = [8, 256], strides = [1, 1]} : vector<8x384xf32> to vector<8x256xf32>
    %190 = vector.extract_strided_slice %188 {offsets = [0, 256], sizes = [8, 128], strides = [1, 1]} : vector<8x384xf32> to vector<8x128xf32>
    %191 = arith.truncf %180 : vector<8x128xf32> to vector<8x128xbf16>
    %cst_69 = arith.constant dense<0.000000e+00> : vector<8x256xf32>
    %192 = tpu.matmul %191, %3, %cst_69 {dimension_numbers = #tpu.dot_dimension_numbers<[1], [0], [0], [1], [0, 0, 1, 1], [], []>} : vector<8x128xbf16>, vector<128x256xbf16>, vector<8x256xf32> -> vector<8x256xf32>
    %193 = arith.addf %189, %192 : vector<8x256xf32>
    %194 = arith.negf %193 : vector<8x256xf32>
    %195 = math.exp %194 : vector<8x256xf32>
    %cst_70 = arith.constant 1.000000e+00 : f32
    %196 = vector.broadcast %cst_70 : f32 to vector<8x256xf32>
    %197 = arith.addf %196, %195 : vector<8x256xf32>
    %198 = arith.divf %196, %197 : vector<8x256xf32>
    %199 = vector.extract_strided_slice %198 {offsets = [0, 0], sizes = [8, 128], strides = [1, 1]} : vector<8x256xf32> to vector<8x128xf32>
    %200 = vector.extract_strided_slice %198 {offsets = [0, 128], sizes = [8, 128], strides = [1, 1]} : vector<8x256xf32> to vector<8x128xf32>
    %201 = arith.mulf %180, %199 : vector<8x128xf32>
    %202 = arith.truncf %201 : vector<8x128xf32> to vector<8x128xbf16>
    %cst_71 = arith.constant dense<0.000000e+00> : vector<8x128xf32>
    %203 = tpu.matmul %202, %4, %cst_71 {dimension_numbers = #tpu.dot_dimension_numbers<[1], [0], [0], [1], [0, 0, 1, 1], [], []>} : vector<8x128xbf16>, vector<128x128xbf16>, vector<8x128xf32> -> vector<8x128xf32>
    %204 = arith.addf %190, %203 : vector<8x128xf32>
    %205 = math.tanh %204 : vector<8x128xf32>
    %206 = arith.mulf %200, %180 : vector<8x128xf32>
    %cst_72 = arith.constant 1.000000e+00 : f32
    %207 = vector.broadcast %cst_72 : f32 to vector<8x128xf32>
    %208 = arith.subf %207, %200 : vector<8x128xf32>
    %209 = arith.mulf %208, %205 : vector<8x128xf32>
    %210 = arith.addf %206, %209 : vector<8x128xf32>
    %211 = arith.truncf %210 : vector<8x128xf32> to vector<8x128xbf16>
    %c0_73 = arith.constant 0 : index
    %212 = arith.index_cast %c6_i32 : i32 to index
    %c0_74 = arith.constant 0 : index
    %c0_75 = arith.constant 0 : index
    %213 = vector.load %arg6[%c0_73, %212, %c0_74, %c0_75] : memref<1x8x8x128xbf16, #tpu.memory_space<vmem>>, vector<1x1x8x128xbf16>
    %214 = vector.shape_cast %213 : vector<1x1x8x128xbf16> to vector<8x128xbf16>
    %215 = vector.shape_cast %211 : vector<8x128xbf16> to vector<1x1x8x128xbf16>
    tpu.vector_store %arg6[%c0_73, %212, %c0_74, %c0_75], %215 {strides = array<i32>} : memref<1x8x8x128xbf16, #tpu.memory_space<vmem>>, vector<1x1x8x128xbf16>,
    %c7_i32 = arith.constant 7 : i32
    %c0_76 = arith.constant 0 : index
    %216 = arith.index_cast %c7_i32 : i32 to index
    %c0_77 = arith.constant 0 : index
    %c0_78 = arith.constant 0 : index
    %217 = vector.load %arg2[%c0_76, %216, %c0_77, %c0_78] : memref<1x8x8x384xf32, #tpu.memory_space<vmem>>, vector<1x1x8x384xf32>
    %218 = vector.shape_cast %217 : vector<1x1x8x384xf32> to vector<8x384xf32>
    %219 = vector.extract_strided_slice %218 {offsets = [0, 0], sizes = [8, 256], strides = [1, 1]} : vector<8x384xf32> to vector<8x256xf32>
    %220 = vector.extract_strided_slice %218 {offsets = [0, 256], sizes = [8, 128], strides = [1, 1]} : vector<8x384xf32> to vector<8x128xf32>
    %221 = arith.truncf %210 : vector<8x128xf32> to vector<8x128xbf16>
    %cst_79 = arith.constant dense<0.000000e+00> : vector<8x256xf32>
    %222 = tpu.matmul %221, %3, %cst_79 {dimension_numbers = #tpu.dot_dimension_numbers<[1], [0], [0], [1], [0, 0, 1, 1], [], []>} : vector<8x128xbf16>, vector<128x256xbf16>, vector<8x256xf32> -> vector<8x256xf32>
    %223 = arith.addf %219, %222 : vector<8x256xf32>
    %224 = arith.negf %223 : vector<8x256xf32>
    %225 = math.exp %224 : vector<8x256xf32>
    %cst_80 = arith.constant 1.000000e+00 : f32
    %226 = vector.broadcast %cst_80 : f32 to vector<8x256xf32>
    %227 = arith.addf %226, %225 : vector<8x256xf32>
    %228 = arith.divf %226, %227 : vector<8x256xf32>
    %229 = vector.extract_strided_slice %228 {offsets = [0, 0], sizes = [8, 128], strides = [1, 1]} : vector<8x256xf32> to vector<8x128xf32>
    %230 = vector.extract_strided_slice %228 {offsets = [0, 128], sizes = [8, 128], strides = [1, 1]} : vector<8x256xf32> to vector<8x128xf32>
    %231 = arith.mulf %210, %229 : vector<8x128xf32>
    %232 = arith.truncf %231 : vector<8x128xf32> to vector<8x128xbf16>
    %cst_81 = arith.constant dense<0.000000e+00> : vector<8x128xf32>
    %233 = tpu.matmul %232, %4, %cst_81 {dimension_numbers = #tpu.dot_dimension_numbers<[1], [0], [0], [1], [0, 0, 1, 1], [], []>} : vector<8x128xbf16>, vector<128x128xbf16>, vector<8x128xf32> -> vector<8x128xf32>
    %234 = arith.addf %220, %233 : vector<8x128xf32>
    %235 = math.tanh %234 : vector<8x128xf32>
    %236 = arith.mulf %230, %210 : vector<8x128xf32>
    %cst_82 = arith.constant 1.000000e+00 : f32
    %237 = vector.broadcast %cst_82 : f32 to vector<8x128xf32>
    %238 = arith.subf %237, %230 : vector<8x128xf32>
    %239 = arith.mulf %238, %235 : vector<8x128xf32>
    %240 = arith.addf %236, %239 : vector<8x128xf32>
    %241 = arith.truncf %240 : vector<8x128xf32> to vector<8x128xbf16>
    %c0_83 = arith.constant 0 : index
    %242 = arith.index_cast %c7_i32 : i32 to index
    %c0_84 = arith.constant 0 : index
    %c0_85 = arith.constant 0 : index
    %243 = vector.load %arg6[%c0_83, %242, %c0_84, %c0_85] : memref<1x8x8x128xbf16, #tpu.memory_space<vmem>>, vector<1x1x8x128xbf16>
    %244 = vector.shape_cast %243 : vector<1x1x8x128xbf16> to vector<8x128xbf16>
    %245 = vector.shape_cast %241 : vector<8x128xbf16> to vector<1x1x8x128xbf16>
    tpu.vector_store %arg6[%c0_83, %242, %c0_84, %c0_85], %245 {strides = array<i32>} : memref<1x8x8x128xbf16, #tpu.memory_space<vmem>>, vector<1x1x8x128xbf16>,
    %c8_i32 = arith.constant 8 : i32
    %c0_86 = arith.constant 0 : index
    %c0_87 = arith.constant 0 : index
    %246 = vector.load %arg8[%c0_86, %c0_87] : memref<8x128xf32, #tpu.memory_space<vmem>>, vector<8x128xf32>
    tpu.vector_store %arg8[%c0_86, %c0_87], %240 {strides = array<i32>} : memref<8x128xf32, #tpu.memory_space<vmem>>, vector<8x128xf32>,
    %c0_i32_88 = arith.constant 0 : i32
    %247 = arith.cmpi eq, %arg1, %c0_i32_88 : i32
    %248 = arith.extui %247 : i1 to i32
    %c0_i32_89 = arith.constant 0 : i32
    %249 = arith.cmpi ne, %248, %c0_i32_89 : i32
    scf.if %249 {
      %c0_90 = arith.constant 0 : index
      %c0_91 = arith.constant 0 : index
      %250 = vector.load %arg7[%c0_90, %c0_91] : memref<8x128xf32, #tpu.memory_space<vmem>>, vector<8x128xf32>
      tpu.vector_store %arg7[%c0_90, %c0_91], %240 {strides = array<i32>} : memref<8x128xf32, #tpu.memory_space<vmem>>, vector<8x128xf32>,
    } else {
    }
    return
  }
  func.func @transform_0(%arg0: i32, %arg1: i32) -> (i32, i32, i32, i32) {
    %c0_i32 = arith.constant 0 : i32
    %c0_i32_0 = arith.constant 0 : i32
    %c0_i32_1 = arith.constant 0 : i32
    return %arg1, %c0_i32, %arg0, %c0_i32_0 : i32, i32, i32, i32
  }
  func.func @transform_1(%arg0: i32, %arg1: i32) -> (i32, i32) {
    %c0_i32 = arith.constant 0 : i32
    %c0_i32_0 = arith.constant 0 : i32
    return %arg0, %c0_i32 : i32, i32
  }
  func.func @transform_2(%arg0: i32, %arg1: i32) -> (i32, i32) {
    %c0_i32 = arith.constant 0 : i32
    %c0_i32_0 = arith.constant 0 : i32
    %c0_i32_1 = arith.constant 0 : i32
    return %c0_i32, %c0_i32_0 : i32, i32
  }
  func.func @transform_3(%arg0: i32, %arg1: i32) -> (i32, i32) {
    %c0_i32 = arith.constant 0 : i32
    %c0_i32_0 = arith.constant 0 : i32
    %c0_i32_1 = arith.constant 0 : i32
    return %c0_i32, %c0_i32_0 : i32, i32
  }
  func.func @transform_4(%arg0: i32, %arg1: i32) -> (i32, i32, i32, i32) {
    %c0_i32 = arith.constant 0 : i32
    %c0_i32_0 = arith.constant 0 : i32
    %c0_i32_1 = arith.constant 0 : i32
    return %arg1, %c0_i32, %arg0, %c0_i32_0 : i32, i32, i32, i32
  }
  func.func @transform_5(%arg0: i32, %arg1: i32) -> (i32, i32) {
    %c0_i32 = arith.constant 0 : i32
    %c0_i32_0 = arith.constant 0 : i32
    return %arg0, %c0_i32 : i32, i32
  }
}

module attributes {stable_mosaic.version = 11 : i64} {
  func.func @_matmul_bias_kernel(%arg0: i32, %arg1: i32, %arg2: memref<64x128xbf16, #tpu.memory_space<vmem>>, %arg3: memref<128x128xbf16, #tpu.memory_space<vmem>>, %arg4: memref<1x128xf32, #tpu.memory_space<vmem>>, %arg5: memref<64x128xf32, #tpu.memory_space<vmem>>) attributes {dimension_semantics = [#tpu.dimension_semantics<parallel>, #tpu.dimension_semantics<parallel>], iteration_bounds = array<i64: 1, 1>, scalar_prefetch = 0 : i64, scratch_operands = 0 : i64, tpu.core_type = #tpu.core_type<tc>, window_params = [{transform_indices = @transform_0, window_bounds = array<i64: 64, 128>}, {transform_indices = @transform_1, window_bounds = array<i64: 128, 128>}, {transform_indices = @transform_2, window_bounds = array<i64: 1, 128>}, {transform_indices = @transform_3, window_bounds = array<i64: 64, 128>}]} {
    %c0 = arith.constant 0 : index
    %c0_0 = arith.constant 0 : index
    %0 = vector.load %arg2[%c0, %c0_0] : memref<64x128xbf16, #tpu.memory_space<vmem>>, vector<64x128xbf16>
    %c0_1 = arith.constant 0 : index
    %c0_2 = arith.constant 0 : index
    %1 = vector.load %arg3[%c0_1, %c0_2] : memref<128x128xbf16, #tpu.memory_space<vmem>>, vector<128x128xbf16>
    %cst = arith.constant dense<0.000000e+00> : vector<64x128xf32>
    %2 = tpu.matmul %0, %1, %cst {dimension_numbers = #tpu.dot_dimension_numbers<[1], [0], [0], [1], [0, 0, 1, 1], [], []>} : vector<64x128xbf16>, vector<128x128xbf16>, vector<64x128xf32> -> vector<64x128xf32>
    %c0_3 = arith.constant 0 : index
    %c0_4 = arith.constant 0 : index
    %3 = vector.load %arg4[%c0_3, %c0_4] : memref<1x128xf32, #tpu.memory_space<vmem>>, vector<1x128xf32>
    %4 = vector.broadcast %3 : vector<1x128xf32> to vector<64x128xf32>
    %5 = arith.addf %2, %4 : vector<64x128xf32>
    %c0_5 = arith.constant 0 : index
    %c0_6 = arith.constant 0 : index
    %6 = vector.load %arg5[%c0_5, %c0_6] : memref<64x128xf32, #tpu.memory_space<vmem>>, vector<64x128xf32>
    tpu.vector_store %arg5[%c0_5, %c0_6], %5 {strides = array<i32>} : memref<64x128xf32, #tpu.memory_space<vmem>>, vector<64x128xf32>,
    return
  }
  func.func @transform_0(%arg0: i32, %arg1: i32) -> (i32, i32) {
    %c0_i32 = arith.constant 0 : i32
    %c0_i32_0 = arith.constant 0 : i32
    return %arg0, %c0_i32 : i32, i32
  }
  func.func @transform_1(%arg0: i32, %arg1: i32) -> (i32, i32) {
    %c0_i32 = arith.constant 0 : i32
    %c0_i32_0 = arith.constant 0 : i32
    return %c0_i32, %arg1 : i32, i32
  }
  func.func @transform_2(%arg0: i32, %arg1: i32) -> (i32, i32) {
    %c0_i32 = arith.constant 0 : i32
    %c0_i32_0 = arith.constant 0 : i32
    return %c0_i32, %arg1 : i32, i32
  }
  func.func @transform_3(%arg0: i32, %arg1: i32) -> (i32, i32) {
    %c0_i32 = arith.constant 0 : i32
    return %arg0, %arg1 : i32, i32
  }
}

</mosaic_0001>

<bundles_post_ra>
// kernel: gru_poem_forward.5
= control target key start
LH: loop header
LB: loop body
LE: loop exit
PB: predicated region body
PF: predicated region fallthrough
CT: control target
= control target key end

     0   :  { %s355_s1 = inlined_call_operand.vmem [shape: bf16[128,128], index: 1, kind: input, shape index: {}]   ;;  %s356_s0 = inlined_call_operand.vmem [shape: bf16[64,128], index: 0, kind: input, shape index: {}]   ;;  %s357_s2 = inlined_call_operand.vmem [shape: f32[1,128], index: 2, kind: input, shape index: {}]   ;;  %s358_s3 = inlined_call_operand.vmem [shape: f32[64,128], index: 3, kind: output, shape index: {}]  }
   0x1   :  { %v260_v0 = vld [vmem:[%s355_s1 + $0x38] sm:$0xff]   ;;  %v261_v1 = vld [vmem:[%s355_s1 + $0x30] sm:$0xff]   ;;  %v262_v2 = vld [vmem:[%s355_s1 + $0x28] sm:$0xff]  }
   0x2   :  { %220 = vmatprep.subr.bf16.mxu0 %v260_v0  ;;  %244 = vmatprep.subr.bf16.mxu1 %v260_v0  ;;  %v263_v3 = vld [vmem:[%s355_s1 + $0x20] sm:$0xff]   ;;  %v269_v5 = vld [vmem:[%s356_s0 + $0x10] sm:$0xff]   ;;  %v264_v6 = vld [vmem:[%s355_s1 + $0x18] sm:$0xff]  }
   0x3   :  { %221 = vmatpush3.bf16.msra.mxu0 %v260_v0  ;;  %252 = vmatpush3.bf16.msra.mxu1 %v260_v0  ;;  %v268_v4 = vld [vmem:[%s356_s0] sm:$0xff]   ;;  %v265_v7 = vld [vmem:[%s355_s1 + $0x10] sm:$0xff]   ;;  %v266_v8 = vld [vmem:[%s355_s1 + $0x8] sm:$0xff]  }
   0x4   :  { %222 = vmatprep.subr.bf16.mxu0 %v261_v1  ;;  %245 = vmatprep.subr.bf16.mxu1 %v261_v1  ;;  %v267_v9 = vld [vmem:[%s355_s1] sm:$0xff]   ;;  %v270_v10 = vld [vmem:[%s356_s0 + $0x8] sm:$0xff]   ;;  %v271_v11 = vld [vmem:[%s356_s0 + $0x18] sm:$0xff]  }
   0x5   :  { %236 = vmatprep.mubr.bf16.mxu0 %v268_v4  ;;  %240 = vmatprep.mubr.bf16.mxu1 %v269_v5  ;;  %v195_v12 = vld [vmem:[%s357_s2] ss:$0 sm:$0xff] }
   0x7   :  { %223 = vmatpush3.bf16.msra.mxu0 %v261_v1  ;;  %253 = vmatpush3.bf16.msra.mxu1 %v261_v1 }
   0x8   :  { %224 = vmatprep.subr.bf16.mxu0 %v262_v2  ;;  %246 = vmatprep.subr.bf16.mxu1 %v262_v2 }
   0xb   :  { %225 = vmatpush3.bf16.msra.mxu0 %v262_v2  ;;  %254 = vmatpush3.bf16.msra.mxu1 %v262_v2 }
   0xc   :  { %226 = vmatprep.subr.bf16.mxu0 %v263_v3  ;;  %247 = vmatprep.subr.bf16.mxu1 %v263_v3 }
   0xf   :  { %227 = vmatpush3.bf16.msra.mxu0 %v263_v3  ;;  %255 = vmatpush3.bf16.msra.mxu1 %v263_v3 }
  0x10   :  { %228 = vmatprep.subr.bf16.mxu0 %v264_v6  ;;  %248 = vmatprep.subr.bf16.mxu1 %v264_v6 }
  0x13   :  { %229 = vmatpush3.bf16.msra.mxu0 %v264_v6  ;;  %256 = vmatpush3.bf16.msra.mxu1 %v264_v6 }
  0x14   :  { %230 = vmatprep.subr.bf16.mxu0 %v265_v7  ;;  %249 = vmatprep.subr.bf16.mxu1 %v265_v7 }
  0x17   :  { %231 = vmatpush3.bf16.msra.mxu0 %v265_v7  ;;  %257 = vmatpush3.bf16.msra.mxu1 %v265_v7 }
  0x18   :  { %232 = vmatprep.subr.bf16.mxu0 %v266_v8  ;;  %250 = vmatprep.subr.bf16.mxu1 %v266_v8 }
  0x1b   :  { %233 = vmatpush3.bf16.msra.mxu0 %v266_v8  ;;  %258 = vmatpush3.bf16.msra.mxu1 %v266_v8 }
  0x1c   :  { %234 = vmatprep.subr.bf16.mxu0 %v267_v9  ;;  %251 = vmatprep.subr.bf16.mxu1 %v267_v9 }
  0x1f   :  { %235 = vmatpush3.bf16.msra.mxu0 %v267_v9  ;;  %259 = vmatpush3.bf16.msra.mxu1 %v267_v9 }
  0x22   :  { %237 = vmatmul.mubr.bf16.vlgmr.msra.gmra.mxu0 %v270_v10  ;;  %241 = vmatmul.mubr.bf16.vlgmr.msra.gmra.mxu1 %v271_v11 }
  0xe2   :  { %v238_v13 = vpop.f32.mrf.mxu0  ;;  %v242_v14 = vpop.f32.mrf.mxu1 }
  0xe3   :  { %v161_v15 = vadd.f32 %v238_v13, %v195_v12  ;;  %v177_v16 = vadd.f32 %v242_v14, %v195_v12 }
  0xe4   :  { %v152_v17 = vpop.f32.mrf.mxu0  ;;  %v168_v18 = vpop.f32.mrf.mxu1 }
  0xe5   :  { %185 = vst [vmem:[%s358_s3 + $0x10] sm:$0xff] %v161_v15  ;;  %189 = vst [vmem:[%s358_s3 + $0x30] sm:$0xff] %v177_v16  ;;  %v153_v19 = vadd.f32 %v195_v12, %v152_v17  ;;  %v169_v20 = vadd.f32 %v195_v12, %v168_v18 }
  0xe6   :  { %v239_v21 = vpop.f32.mrf.mxu0  ;;  %v243_v22 = vpop.f32.mrf.mxu1 }
  0xe7   :  { %183 = vst [vmem:[%s358_s3] sm:$0xff] %v153_v19  ;;  %187 = vst [vmem:[%s358_s3 + $0x20] sm:$0xff] %v169_v20  ;;  %v164_v23 = vadd.f32 %v239_v21, %v195_v12  ;;  %v180_v24 = vadd.f32 %v243_v22, %v195_v12 }
  0xe8   :  { %v155_v25 = vpop.f32.mrf.mxu0  ;;  %v171_v26 = vpop.f32.mrf.mxu1 }
  0xe9   :  { %186 = vst [vmem:[%s358_s3 + $0x18] sm:$0xff] %v164_v23  ;;  %190 = vst [vmem:[%s358_s3 + $0x38] sm:$0xff] %v180_v24  ;;  %v156_v27 = vadd.f32 %v195_v12, %v155_v25  ;;  %v172_v28 = vadd.f32 %v195_v12, %v171_v26 }
  0xeb   :  { %184 = vst [vmem:[%s358_s3 + $0x8] sm:$0xff] %v156_v27  ;;  %188 = vst [vmem:[%s358_s3 + $0x28] sm:$0xff] %v172_v28 }

// kernel: gru_poem_forward.3
= control target key start
LH: loop header
LB: loop body
LE: loop exit
PB: predicated region body
PF: predicated region fallthrough
CT: control target
= control target key end

     0   :  { %s726_s12 = smov 0   ;;  %s728_s13 = smov 0   ;;  %s837_s0 = inlined_call_operand.vmem [shape: bf16[64,32], index: 0, kind: input, shape index: {}]   ;;  %s838_s1 = inlined_call_operand.vmem [shape: bf16[32,384], index: 1, kind: input, shape index: {}]   ;;  %s839_s2 = inlined_call_operand.vmem [shape: f32[1,384], index: 2, kind: input, shape index: {}]   ;;  %s840_s3 = inlined_call_operand.vmem [shape: f32[64,384], index: 3, kind: output, shape index: {}]  }
   0x1   :  { %s730_s14 = smov 0   ;;  %s732_s15 = smov 0  }
   0x2   :  { %s734_s16 = smov 0  }
   0x3 LB: > { %s22_s17 = sadd.s32 1, %s700_s15  ;;  %s573_s18 = sadd.s32 4294967295, %s704_s16   ;;  %s704_s16 = sphi %s734_s16, %s13_s16   ;;  %s700_s15 = sphi %s732_s15, %s845_s15   ;;  %s696_s14 = sphi %s730_s14, %s844_s14   ;;  %s692_s13 = sphi %s728_s13, %s843_s13   ;;  %s688_s12 = sphi %s726_s12, %s842_s12  }
   0x4   : > { %p23_p0 = scmp.ge.s32.totalorder %s22_s17, 3  ;;  %p65_p1 = scmp.ne.s32.totalorder %s692_s13, %s688_s12 }
   0x5   : > { %p66_p2 = scmp.eq.s32.totalorder %s704_s16, 0  ;;  %p123_p4 = scmp.eq.s32.totalorder %s573_s18, 2 }
   0x6   : > { %s847_s17 = smov (%p23_p0, %s22_s17), 0  ;;  %s58_s20 = sadd.s32 1, %s692_s13 }
   0x7   : > { %p67_p3 = por %p66_p2, %p65_p1  ;;  %s55_s19 = ssub.s32 %s700_s15, %s847_s17 }
   0x8   : > { %p56_p5 = scmp.eq.s32.totalorder %s55_s19, 0  ;;  %p761_p6 = por %p123_p4, %p65_p1 }
   0x9   : > { %p577_p7 = scmp.ge.s32.totalorder %s704_s16, 3 }
   0xa   : > { %s766_s22 = scalar_select %p56_p5, %s692_s13, %s58_s20  }
   0xb   : > { %154 = sbr.rel (%p577_p7) target bundleno = 22 (0x16), region = 20 }
  0x10   : > { %157 = sbr.rel (!%p67_p3) target bundleno = 22 (0x16), region = 24  ;;  %s159_s23 = sand.u32 (%p67_p3), 1, %s692_s13  }
  0x11   : > { %s579_s24 = sshll.u32 (%p67_p3), %s700_s15, 2  ;;  %s578_s25 = sshll.u32 (%p67_p3), %s159_s23, 4 }
  0x12   : > { %s163_s28 = scalar_lea.vmem (%p67_p3), %s838_s1, %s579_s24  ;;  %s161_s29 = scalar_lea.vmem (%p67_p3), [#allocation2], %s578_s25 }
  0x13   : > { %v180_v0 = vld [vmem:[%s163_s28] sm:$0xf] (%p67_p3)  ;;  %v182_v1 = vld [vmem:[%s163_s28 + $0xc] sm:$0xf] (%p67_p3)  ;;  %v184_v2 = vld [vmem:[%s163_s28 + $0x18] sm:$0xf] (%p67_p3) }
  0x14   : > { %181 = vst [vmem:[%s161_s29] sm:$0xf] (%p67_p3), %v180_v0  ;;  %183 = vst [vmem:[%s161_s29 + $0x4] sm:$0xf] (%p67_p3), %v182_v1  ;;  %v186_v3 = vld [vmem:[%s163_s28 + $0x24] sm:$0xf] (%p67_p3) }
  0x15   : > { %185 = vst [vmem:[%s161_s29 + $0x8] sm:$0xf] %v184_v2  ;;  %187 = vst [vmem:[%s161_s29 + $0xc] sm:$0xf] %v186_v3 }
  0x16 PF: > { %p580_p8 = scmp.ge.s32.totalorder %s704_s16, 1  ;;  %p224_p9 = scmp.lt.s32.totalorder %s704_s16, 4 }
  0x18   : > { %p225_p10 = pnand %p580_p8, %p224_p9 }
  0x19   : > { %s231_s30 = sand.u32 (!%p225_p10), 1, %s688_s12   ;;  %p267_p11 = scmp.lt.s32.totalorder (!%p225_p10), %s696_s14, 2 }
  0x1a   : > { %228 = sbr.rel (%p225_p10) target bundleno = 252 (0xfc), region = 69  ;;  %s581_s6 = sshll.u32 (!%p225_p10), %s231_s30, 4 }
  0x1b   : > { %s233_s9 = scalar_lea.vmem (!%p225_p10), [#allocation2], %s581_s6  ;;  %s582_s25 = sshll.u32 (!%p225_p10), %s231_s30, 6 }
  0x1c   : > { %s798_s26 = scalar_lea.vmem (!%p225_p10), [#allocation3], %s582_s25 }
  0x1f   : > { %v662_v4 = vld [vmem:[%s837_s0] sm:$0xff]   ;;  %vm323_vm0 = vcmask 261120   ;;  %v663_v5 = vld [vmem:[%s837_s0 + $0x10] sm:$0xff]   ;;  %v660_v6 = vld [vmem:[%s233_s9 + $0x8] sm:$0xff]   ;;  %s268_s19 = scalar_select %p267_p11, %s696_s14, 2 }
  0x20   : > { %608 = vmatprep.mubr.msk.bf16.mxu0 %vm323_vm0, %v662_v4  ;;  %612 = vmatprep.mubr.msk.bf16.mxu1 %vm323_vm0, %v663_v5  ;;  %v661_v7 = vld [vmem:[%s233_s9] sm:$0xff]   ;;  %v664_v8 = vld [vmem:[%s837_s0 + $0x8] sm:$0xff]   ;;  %v665_v9 = vld [vmem:[%s837_s0 + $0x18] sm:$0xff]   ;;  %s595_s27 = sshll.u32 (%p761_p6), %s696_s14, 3 }
  0x21   : > { %604 = vmatprep.subr.bf16.mxu0 %v660_v6  ;;  %616 = vmatprep.subr.bf16.mxu1 %v660_v6  ;;  %s269_s24 = scalar_lea.vmem %s839_s2, %s268_s19  ;;  %s420_s30 = scalar_lea.vmem (%p761_p6), %s840_s3, %s595_s27 }
  0x22   : > { %605 = vmatpush3.bf16.msra.mxu0 %v660_v6  ;;  %618 = vmatpush3.bf16.msra.mxu1 %v660_v6  ;;  %v583_v10 = vld [vmem:[%s269_s24] ss:$0 sm:$0xff] }
  0x23   : > { %606 = vmatprep.subr.bf16.mxu0 %v661_v7  ;;  %617 = vmatprep.subr.bf16.mxu1 %v661_v7 }
  0x26   : > { %607 = vmatpush3.bf16.msra.mxu0 %v661_v7  ;;  %619 = vmatpush3.bf16.msra.mxu1 %v661_v7 }
  0x29   : > { %609 = vmatmul.mubr.msk.bf16.vlgmr.msra.gmra.mxu0 %vm323_vm0, %v664_v8  ;;  %613 = vmatmul.mubr.msk.bf16.vlgmr.msra.gmra.mxu1 %vm323_vm0, %v665_v9 }
  0xe9   : > { %v610_v11 = vpop.f32.mrf.mxu0  ;;  %v614_v12 = vpop.f32.mrf.mxu1 }
  0xea   : > { %v379_v13 = vadd.f32 %v610_v11, %v583_v10  ;;  %v395_v14 = vadd.f32 %v614_v12, %v583_v10 }
  0xeb   : > { %v370_v15 = vpop.f32.mrf.mxu0  ;;  %v386_v16 = vpop.f32.mrf.mxu1 }
  0xec   : > { %403 = vst [vmem:[%s798_s26 + $0x10] sm:$0xff] %v379_v13  ;;  %407 = vst [vmem:[%s798_s26 + $0x30] sm:$0xff] %v395_v14  ;;  %v371_v17 = vadd.f32 %v583_v10, %v370_v15  ;;  %v387_v18 = vadd.f32 %v583_v10, %v386_v16 }
  0xed   : > { %v611_v19 = vpop.f32.mrf.mxu0  ;;  %v615_v20 = vpop.f32.mrf.mxu1 }
  0xee   : > { %401 = vst [vmem:[%s798_s26] sm:$0xff] %v371_v17  ;;  %405 = vst [vmem:[%s798_s26 + $0x20] sm:$0xff] %v387_v18  ;;  %v382_v21 = vadd.f32 %v611_v19, %v583_v10  ;;  %v398_v22 = vadd.f32 %v615_v20, %v583_v10  ;;  %415 = sbr.rel (!%p761_p6) target bundleno = 252 (0xfc), region = 77 }
  0xef   : > { %v373_v23 = vpop.f32.mrf.mxu0  ;;  %v389_v24 = vpop.f32.mrf.mxu1 }
  0xf0   : > { %404 = vst [vmem:[%s798_s26 + $0x18] sm:$0xff] %v382_v21  ;;  %408 = vst [vmem:[%s798_s26 + $0x38] sm:$0xff] %v398_v22  ;;  %v374_v25 = vadd.f32 %v583_v10, %v373_v23  ;;  %v390_v26 = vadd.f32 %v583_v10, %v389_v24 }
  0xf2   : > { %402 = vst [vmem:[%s798_s26 + $0x8] sm:$0xff] %v374_v25  ;;  %406 = vst [vmem:[%s798_s26 + $0x28] sm:$0xff] %v390_v26 }
  0xf3   : > { %v467_v29 = vld [vmem:[%s798_s26 + $0x10] sm:$0xff] }
  0xf4   : > { %468 = vst [vmem:[%s420_s30 + $0x30] sm:$0xff] %v467_v29  ;;  %v475_v33 = vld [vmem:[%s798_s26 + $0x30] sm:$0xff] }
  0xf5   : > { %v463_v27 = vld [vmem:[%s798_s26] sm:$0xff]  ;;  %476 = vst [vmem:[%s420_s30 + $0x90] sm:$0xff] %v475_v33 }
  0xf6   : > { %v471_v31 = vld [vmem:[%s798_s26 + $0x20] sm:$0xff]  ;;  %464 = vst [vmem:[%s420_s30] sm:$0xff] %v463_v27 }
  0xf7   : > { %v469_v30 = vld [vmem:[%s798_s26 + $0x18] sm:$0xff]  ;;  %472 = vst [vmem:[%s420_s30 + $0x60] sm:$0xff] %v471_v31 }
  0xf8   : > { %470 = vst [vmem:[%s420_s30 + $0x48] sm:$0xff] %v469_v30  ;;  %v477_v34 = vld [vmem:[%s798_s26 + $0x38] sm:$0xff] }
  0xf9   : > { %v465_v28 = vld [vmem:[%s798_s26 + $0x8] sm:$0xff]  ;;  %478 = vst [vmem:[%s420_s30 + $0xa8] sm:$0xff] %v477_v34 }
  0xfa   : > { %v473_v32 = vld [vmem:[%s798_s26 + $0x28] sm:$0xff]  ;;  %466 = vst [vmem:[%s420_s30 + $0x18] sm:$0xff] %v465_v28 }
  0xfb   : > { %474 = vst [vmem:[%s420_s30 + $0x78] sm:$0xff] %v473_v32 }
  0xfc PF: > { %s13_s16 = sadd.s32 1, %s704_s16   ;;  %s842_s12 = smov %s692_s13 }
  0xfd   : > { %p10_p12 = scmp.ge.s32.totalorder %s13_s16, 5   ;;  %s843_s13 = smov %s766_s22 }
  0xfe   : > { %s844_s14 = smov %s700_s15  ;;  %s845_s15 = smov %s847_s17 }
  0xff   :  { %12 = sbr.rel (!%p10_p12) target bundleno = 3 (0x3), region = 152 }

// kernel: gru_poem_forward.4
= control target key start
LH: loop header
LB: loop body
LE: loop exit
PB: predicated region body
PF: predicated region fallthrough
CT: control target
= control target key end

     0   :  { %v1500_v1 = vmov 0   ;;  %v1501_v20 = vmov 0.0   ;;  %vm1502_vm0 = vmmov 0   ;;  %s2089_s2 = inlined_call_operand.vmem [shape: bf16[128,256], index: 2, kind: input, shape index: {}]   ;;  %s2090_s1 = inlined_call_operand.vmem [shape: f32[8,128], index: 1, kind: input, shape index: {}]   ;;  %s2091_s3 = inlined_call_operand.vmem [shape: bf16[128,128], index: 3, kind: input, shape index: {}]   ;;  %s2092_s0 = inlined_call_operand.vmem [shape: f32[1,8,8,384], index: 0, kind: input, shape index: {}]   ;;  %s2093_s4 = inlined_call_operand.vmem [shape: bf16[1,8,8,128], index: 4, kind: output, shape index: {0}]   ;;  %s2094_s5 = inlined_call_operand.vmem [shape: f32[8,128], index: 5, kind: output, shape index: {1}]  }
   0x1   :  { %v1536_v0 = vld [vmem:[%s2089_s2 + $0x74] ss:$8 sps:$4 sm:$0xff]   ;;  %175 = vmatprep.mubr.bf16.mxu0 %v1500_v1  ;;  %v1542_v2 = vld [vmem:[%s2089_s2 + $0x70] ss:$8 sps:$4 sm:$0xff]   ;;  %v1548_v3 = vld [vmem:[%s2089_s2 + $0x64] ss:$8 sps:$4 sm:$0xff]   ;;  %1219 = vmatprep.subr.bf16.mxu1 %v1501_v20 }
   0x2   :  { %143 = vmatprep.subr.bf16.mxu0 %v1536_v0  ;;  %v1554_v4 = vld [vmem:[%s2089_s2 + $0x60] ss:$8 sps:$4 sm:$0xff]   ;;  %v1560_v5 = vld [vmem:[%s2089_s2 + $0x54] ss:$8 sps:$4 sm:$0xff]   ;;  %v1566_v6 = vld [vmem:[%s2089_s2 + $0x50] ss:$8 sps:$4 sm:$0xff]   ;;  %1235 = vmatprep.mubr.msk.bf16.mxu1 %vm1502_vm0, %v1501_v20 }
   0x3   :  { %144 = vmatpush1.bf16.msra.mxu0 %v1542_v2  ;;  %v1572_v7 = vld [vmem:[%s2089_s2 + $0x44] ss:$8 sps:$4 sm:$0xff]   ;;  %v1578_v8 = vld [vmem:[%s2089_s2 + $0x40] ss:$8 sps:$4 sm:$0xff]   ;;  %v1584_v9 = vld [vmem:[%s2089_s2 + $0x34] ss:$8 sps:$4 sm:$0xff]  }
   0x4   :  { %145 = vmatprep.subr.bf16.mxu0 %v1548_v3  ;;  %v1590_v10 = vld [vmem:[%s2089_s2 + $0x30] ss:$8 sps:$4 sm:$0xff]   ;;  %v1596_v11 = vld [vmem:[%s2089_s2 + $0x24] ss:$8 sps:$4 sm:$0xff]   ;;  %v1602_v12 = vld [vmem:[%s2089_s2 + $0x20] ss:$8 sps:$4 sm:$0xff]  }
   0x5   :  { %v1608_v13 = vld [vmem:[%s2089_s2 + $0x14] ss:$8 sps:$4 sm:$0xff]   ;;  %v1614_v14 = vld [vmem:[%s2089_s2 + $0x10] ss:$8 sps:$4 sm:$0xff]   ;;  %v1620_v15 = vld [vmem:[%s2089_s2 + $0x4] ss:$8 sps:$4 sm:$0xff]  }
   0x6   :  { %v1626_v16 = vld [vmem:[%s2089_s2] ss:$8 sps:$4 sm:$0xff]   ;;  %v1658_v19 = vld [vmem:[%s2091_s3 + $0x38] sm:$0xff]   ;;  %v1666_v21 = vld [vmem:[%s2091_s3 + $0x30] sm:$0xff]  }
   0x7   :  { %146 = vmatpush1.bf16.msra.mxu0 %v1554_v4  ;;  %v1631_v17 = vld [vmem:[%s2090_s1] sm:$0xff]  ;;  %1220 = vmatpush3.bf16.msra.mxu1 %v1658_v19  ;;  %v1673_v22 = vld [vmem:[%s2091_s3 + $0x28] sm:$0xff]   ;;  %v1687_v24 = vld [vmem:[%s2091_s3 + $0x18] sm:$0xff]  }
   0x8   :  { %147 = vmatprep.subr.bf16.mxu0 %v1560_v5  ;;  %v62_v18 = vpack.c.bf16 %v1631_v17, %v1631_v17  ;;  %1221 = vmatprep.subr.bf16.mxu1 %v1501_v20  ;;  %v1680_v23 = vld [vmem:[%s2091_s3 + $0x20] sm:$0xff]   ;;  %v1693_v25 = vld [vmem:[%s2091_s3 + $0x10] sm:$0xff]   ;;  %v1702_v26 = vld [vmem:[%s2091_s3 + $0x8] sm:$0xff]  }
   0x9   :  { %v1709_v27 = vld [vmem:[%s2091_s3] sm:$0xff]   ;;  %v60_v40 = vld [vmem:[%s2092_s0 + $0x8] sm:$0xff]  ;;  %v61_v45 = vld [vmem:[%s2092_s0 + $0x10] sm:$0xff] }
   0xa   :  { %v59_v28 = vld [vmem:[%s2092_s0] sm:$0xff]  ;;  %v1105_v58 = vld [vmem:[%s2092_s0 + $0x18] sm:$0xff] }
   0xb   :  { %148 = vmatpush1.bf16.msra.mxu0 %v1566_v6  ;;  %1222 = vmatpush3.bf16.msra.mxu1 %v1666_v21 }
   0xc   :  { %149 = vmatprep.subr.bf16.mxu0 %v1572_v7  ;;  %1223 = vmatprep.subr.bf16.mxu1 %v1501_v20 }
   0xf   :  { %150 = vmatpush1.bf16.msra.mxu0 %v1578_v8  ;;  %1224 = vmatpush3.bf16.msra.mxu1 %v1673_v22 }
  0x10   :  { %151 = vmatprep.subr.bf16.mxu0 %v1584_v9  ;;  %1225 = vmatprep.subr.bf16.mxu1 %v1501_v20 }
  0x13   :  { %152 = vmatpush1.bf16.msra.mxu0 %v1590_v10  ;;  %1226 = vmatpush3.bf16.msra.mxu1 %v1680_v23 }
  0x14   :  { %153 = vmatprep.subr.bf16.mxu0 %v1596_v11  ;;  %1227 = vmatprep.subr.bf16.mxu1 %v1501_v20 }
  0x17   :  { %154 = vmatpush1.bf16.msra.mxu0 %v1602_v12  ;;  %1228 = vmatpush3.bf16.msra.mxu1 %v1687_v24 }
  0x18   :  { %155 = vmatprep.subr.bf16.mxu0 %v1608_v13  ;;  %1229 = vmatprep.subr.bf16.mxu1 %v1501_v20 }
  0x1b   :  { %156 = vmatpush1.bf16.msra.mxu0 %v1614_v14  ;;  %1230 = vmatpush3.bf16.msra.mxu1 %v1693_v25 }
  0x1c   :  { %157 = vmatprep.subr.bf16.mxu0 %v1620_v15  ;;  %1231 = vmatprep.subr.bf16.mxu1 %v1501_v20 }
  0x1f   :  { %158 = vmatpush1.bf16.msra.mxu0 %v1626_v16  ;;  %1232 = vmatpush3.bf16.msra.mxu1 %v1702_v26 }
  0x20   :  { %300 = vmatprep.subr.bf16.mxu0 %v1536_v0  ;;  %1233 = vmatprep.subr.bf16.mxu1 %v1501_v20 }
  0x22   :  { %176 = vmatmul.mubr.bf16.vlgmr.msra.gmra.mxu0 %v62_v18 }
  0x23   :  { %301 = vmatpush1.bf16.msra.mxu0 %v1542_v2  ;;  %332 = vmatprep.mubr.bf16.mxu0 %v1500_v1 }
  0x24   :  { %302 = vmatprep.subr.bf16.mxu0 %v1548_v3  ;;  %1234 = vmatpush3.bf16.msra.mxu1 %v1709_v27 }
  0x25   :  { %1239 = vmatprep.subr.bf16.mxu1 %v1501_v20 }
  0x27   :  { %303 = vmatpush1.bf16.msra.mxu0 %v1554_v4 }
  0x28   :  { %304 = vmatprep.subr.bf16.mxu0 %v1560_v5 }
  0x2b   :  { %305 = vmatpush1.bf16.msra.mxu0 %v1566_v6 }
  0x2c   :  { %306 = vmatprep.subr.bf16.mxu0 %v1572_v7 }
  0x2f   :  { %307 = vmatpush1.bf16.msra.mxu0 %v1578_v8 }
  0x30   :  { %308 = vmatprep.subr.bf16.mxu0 %v1584_v9 }
  0x33   :  { %309 = vmatpush1.bf16.msra.mxu0 %v1590_v10 }
  0x34   :  { %310 = vmatprep.subr.bf16.mxu0 %v1596_v11 }
  0x37   :  { %311 = vmatpush1.bf16.msra.mxu0 %v1602_v12 }
  0x38   :  { %312 = vmatprep.subr.bf16.mxu0 %v1608_v13 }
  0x3b   :  { %313 = vmatpush1.bf16.msra.mxu0 %v1614_v14 }
  0x3c   :  { %314 = vmatprep.subr.bf16.mxu0 %v1620_v15 }
  0x3f   :  { %315 = vmatpush1.bf16.msra.mxu0 %v1626_v16 }
  0x40   :  { %410 = vmatprep.subr.bf16.mxu0 %v1536_v0 }
  0xe2   :  { %v177_v29 = vpop.f32.mrf.mxu0 }
  0xe3   :  { %v184_v30 = vadd.f32 %v177_v29, %v59_v28 }
  0xe4   :  { %v179_v31 = vpop.f32.mrf.mxu0 }
  0xe5   :  { %v1095_v32 = vmul.f32 -1.442695, %v184_v30  ;;  %v185_v41 = vadd.f32 %v179_v31, %v60_v40 }
  0xe6   :  { %v181_v33 = vpop.f32.mrf.mxu0 }
  0xe7   :  { %1414 = vpow2.f32 %v1095_v32  ;;  %v1096_v42 = vmul.f32 -1.442695, %v185_v41  ;;  %v1106_v32 = vld [vmem:[%s2092_s0 + $0x20] sm:$0xff] }
  0xe8   :  { %v182_v34 = vpop.f32.mrf.mxu0 }
  0xf4   :  { %v1415_v35 = vpop.eup %1414 }
  0xf5   :  { %v192_v36 = vadd.f32 1.0, %v1415_v35 }
  0xf7   :  { %1416 = vrcp.f32 %v192_v36 }
  0xf8   :  { %1418 = vpow2.f32 %v1096_v42 }
 0x104   :  { %v1417_v37 = vpop.eup %1416 }
 0x105   :  { %v198_v38 = vmul.f32 %v1417_v37, %v1631_v17  ;;  %v1419_v43 = vpop.eup %1418  ;;  %v1107_v37 = vld [vmem:[%s2092_s0 + $0x28] sm:$0xff] }
 0x106   :  { %v193_v44 = vadd.f32 1.0, %v1419_v43 }
 0x107   :  { %v199_v39 = vpack.c.bf16 %v198_v38, %v198_v38 }
 0x108   :  { %1420 = vrcp.f32 %v193_v44 }
 0x109   :  { %1236 = vmatmul.mubr.bf16.vlgmr.msra.gmra.mxu1 %v199_v39 }
 0x10a   :  { %1240 = vmatpush3.bf16.msra.mxu1 %v1658_v19  ;;  %1255 = vmatprep.mubr.msk.bf16.mxu1 %vm1502_vm0, %v1501_v20 }
 0x10b   :  { %1241 = vmatprep.subr.bf16.mxu1 %v1501_v20 }
 0x10e   :  { %1242 = vmatpush3.bf16.msra.mxu1 %v1666_v21 }
 0x10f   :  { %1243 = vmatprep.subr.bf16.mxu1 %v1501_v20 }
 0x112   :  { %1244 = vmatpush3.bf16.msra.mxu1 %v1673_v22 }
 0x113   :  { %1245 = vmatprep.subr.bf16.mxu1 %v1501_v20 }
 0x115   :  { %v1421_v51 = vpop.eup %1420 }
 0x116   :  { %1246 = vmatpush3.bf16.msra.mxu1 %v1680_v23  ;;  %v291_v52 = vsub.f32 1.0, %v1421_v51  ;;  %v290_v54 = vmul.f32 %v1421_v51, %v1631_v17 }
 0x117   :  { %1247 = vmatprep.subr.bf16.mxu1 %v1501_v20 }
 0x11a   :  { %1248 = vmatpush3.bf16.msra.mxu1 %v1687_v24 }
 0x11b   :  { %1249 = vmatprep.subr.bf16.mxu1 %v1501_v20 }
 0x11e   :  { %1250 = vmatpush3.bf16.msra.mxu1 %v1693_v25 }
 0x11f   :  { %1251 = vmatprep.subr.bf16.mxu1 %v1501_v20 }
 0x122   :  { %1252 = vmatpush3.bf16.msra.mxu1 %v1702_v26 }
 0x123   :  { %1253 = vmatprep.subr.bf16.mxu1 %v1501_v20 }
 0x126   :  { %1254 = vmatpush3.bf16.msra.mxu1 %v1709_v27 }
 0x127   :  { %1259 = vmatprep.subr.bf16.mxu1 %v1501_v20 }
 0x1c9   :  { %v282_v46 = vpop.f32.mrf.mxu1 }
 0x1ca   :  { %v288_v47 = vadd.f32 %v282_v46, %v61_v45 }
 0x1cb   :  { %v1237_v48 = vpop.f32.mrf.mxu1 }
 0x1cc   :  { %1422 = vtanh.f32 %v288_v47 }
 0x1cd   :  { %v285_v49 = vpop.f32.mrf.mxu1 }
 0x1cf   :  { %v1238_v50 = vpop.f32.mrf.mxu1 }
 0x1d0   :  { %v1111_v50 = vld [vmem:[%s2092_s0 + $0x30] sm:$0xff] }
 0x1d9   :  { %v1423_v53 = vpop.eup %1422 }
 0x1da   :  { %v292_v55 = vmul.f32 %v1423_v53, %v291_v52 }
 0x1dc   :  { %v1743_v56 = vadd.f32 %v292_v55, %v290_v54 }
 0x1de   :  { %v294_v57 = vpack.c.bf16 %v1743_v56, %v1743_v56 }
 0x1e0   :  { %295 = vst [vmem:[%s2093_s4] sm:$0xf] %v294_v57  ;;  %333 = vmatmul.mubr.bf16.vlgmr.msra.gmra.mxu0 %v294_v57 }
 0x1e1   :  { %411 = vmatpush1.bf16.msra.mxu0 %v1542_v2  ;;  %442 = vmatprep.mubr.bf16.mxu0 %v1500_v1 }
 0x1e2   :  { %412 = vmatprep.subr.bf16.mxu0 %v1548_v3 }
 0x1e5   :  { %413 = vmatpush1.bf16.msra.mxu0 %v1554_v4 }
 0x1e6   :  { %414 = vmatprep.subr.bf16.mxu0 %v1560_v5 }
 0x1e9   :  { %415 = vmatpush1.bf16.msra.mxu0 %v1566_v6 }
 0x1ea   :  { %416 = vmatprep.subr.bf16.mxu0 %v1572_v7 }
 0x1ed   :  { %417 = vmatpush1.bf16.msra.mxu0 %v1578_v8 }
 0x1ee   :  { %418 = vmatprep.subr.bf16.mxu0 %v1584_v9 }
 0x1f1   :  { %419 = vmatpush1.bf16.msra.mxu0 %v1590_v10 }
 0x1f2   :  { %420 = vmatprep.subr.bf16.mxu0 %v1596_v11 }
 0x1f5   :  { %421 = vmatpush1.bf16.msra.mxu0 %v1602_v12 }
 0x1f6   :  { %422 = vmatprep.subr.bf16.mxu0 %v1608_v13 }
 0x1f9   :  { %423 = vmatpush1.bf16.msra.mxu0 %v1614_v14 }
 0x1fa   :  { %424 = vmatprep.subr.bf16.mxu0 %v1620_v15 }
 0x1fd   :  { %425 = vmatpush1.bf16.msra.mxu0 %v1626_v16 }
 0x1fe   :  { %520 = vmatprep.subr.bf16.mxu0 %v1536_v0 }
 0x2a0   :  { %v334_v59 = vpop.f32.mrf.mxu0 }
 0x2a1   :  { %v341_v60 = vadd.f32 %v1105_v58, %v334_v59 }
 0x2a2   :  { %v336_v61 = vpop.f32.mrf.mxu0 }
 0x2a3   :  { %v1108_v62 = vmul.f32 -1.442695, %v341_v60  ;;  %v342_v33 = vadd.f32 %v1106_v32, %v336_v61 }
 0x2a4   :  { %v338_v63 = vpop.f32.mrf.mxu0 }
 0x2a5   :  { %1424 = vpow2.f32 %v1108_v62  ;;  %v1109_v34 = vmul.f32 -1.442695, %v342_v33  ;;  %v1112_v62 = vld [vmem:[%s2092_s0 + $0x38] sm:$0xff] }
 0x2a6   :  { %v339_v17 = vpop.f32.mrf.mxu0 }
 0x2b2   :  { %v1425_v18 = vpop.eup %1424 }
 0x2b3   :  { %v349_v28 = vadd.f32 1.0, %v1425_v18 }
 0x2b5   :  { %1426 = vrcp.f32 %v349_v28 }
 0x2b6   :  { %1428 = vpow2.f32 %v1109_v34 }
 0x2c2   :  { %v1427_v29 = vpop.eup %1426 }
 0x2c3   :  { %v355_v30 = vmul.f32 %v1427_v29, %v1743_v56  ;;  %v1429_v35 = vpop.eup %1428  ;;  %v1113_v29 = vld [vmem:[%s2092_s0 + $0x40] sm:$0xff] }
 0x2c4   :  { %v350_v36 = vadd.f32 1.0, %v1429_v35 }
 0x2c5   :  { %v356_v31 = vpack.c.bf16 %v355_v30, %v355_v30 }
 0x2c6   :  { %1430 = vrcp.f32 %v350_v36 }
 0x2c7   :  { %1256 = vmatmul.mubr.bf16.vlgmr.msra.gmra.mxu1 %v356_v31 }
 0x2c8   :  { %1260 = vmatpush3.bf16.msra.mxu1 %v1658_v19  ;;  %1275 = vmatprep.mubr.msk.bf16.mxu1 %vm1502_vm0, %v1501_v20 }
 0x2c9   :  { %1261 = vmatprep.subr.bf16.mxu1 %v1501_v20 }
 0x2cc   :  { %1262 = vmatpush3.bf16.msra.mxu1 %v1666_v21 }
 0x2cd   :  { %1263 = vmatprep.subr.bf16.mxu1 %v1501_v20 }
 0x2d0   :  { %1264 = vmatpush3.bf16.msra.mxu1 %v1673_v22 }
 0x2d1   :  { %1265 = vmatprep.subr.bf16.mxu1 %v1501_v20 }
 0x2d3   :  { %v1431_v43 = vpop.eup %1430 }
 0x2d4   :  { %1266 = vmatpush3.bf16.msra.mxu1 %v1680_v23  ;;  %v400_v44 = vsub.f32 1.0, %v1431_v43  ;;  %v399_v46 = vmul.f32 %v1431_v43, %v1743_v56 }
 0x2d5   :  { %1267 = vmatprep.subr.bf16.mxu1 %v1501_v20 }
 0x2d8   :  { %1268 = vmatpush3.bf16.msra.mxu1 %v1687_v24 }
 0x2d9   :  { %1269 = vmatprep.subr.bf16.mxu1 %v1501_v20 }
 0x2dc   :  { %1270 = vmatpush3.bf16.msra.mxu1 %v1693_v25 }
 0x2dd   :  { %1271 = vmatprep.subr.bf16.mxu1 %v1501_v20 }
 0x2e0   :  { %1272 = vmatpush3.bf16.msra.mxu1 %v1702_v26 }
 0x2e1   :  { %1273 = vmatprep.subr.bf16.mxu1 %v1501_v20 }
 0x2e4   :  { %1274 = vmatpush3.bf16.msra.mxu1 %v1709_v27 }
 0x2e5   :  { %1279 = vmatprep.subr.bf16.mxu1 %v1501_v20 }
 0x387   :  { %v391_v38 = vpop.f32.mrf.mxu1 }
 0x388   :  { %v397_v39 = vadd.f32 %v1107_v37, %v391_v38 }
 0x389   :  { %v1257_v40 = vpop.f32.mrf.mxu1 }
 0x38a   :  { %1432 = vtanh.f32 %v397_v39 }
 0x38b   :  { %v394_v41 = vpop.f32.mrf.mxu1 }
 0x38d   :  { %v1258_v42 = vpop.f32.mrf.mxu1 }
 0x38e   :  { %v1117_v42 = vld [vmem:[%s2092_s0 + $0x48] sm:$0xff] }
 0x397   :  { %v1433_v45 = vpop.eup %1432 }
 0x398   :  { %v401_v47 = vmul.f32 %v1433_v45, %v400_v44 }
 0x39a   :  { %v1796_v48 = vadd.f32 %v401_v47, %v399_v46 }
 0x39c   :  { %v403_v49 = vpack.c.bf16 %v1796_v48, %v1796_v48 }
 0x39e   :  { %1110 = vst [vmem:[%s2093_s4 + $0x4] sm:$0xf] %v403_v49  ;;  %443 = vmatmul.mubr.bf16.vlgmr.msra.gmra.mxu0 %v403_v49 }
 0x39f   :  { %521 = vmatpush1.bf16.msra.mxu0 %v1542_v2  ;;  %552 = vmatprep.mubr.bf16.mxu0 %v1500_v1 }
 0x3a0   :  { %522 = vmatprep.subr.bf16.mxu0 %v1548_v3 }
 0x3a3   :  { %523 = vmatpush1.bf16.msra.mxu0 %v1554_v4 }
 0x3a4   :  { %524 = vmatprep.subr.bf16.mxu0 %v1560_v5 }
 0x3a7   :  { %525 = vmatpush1.bf16.msra.mxu0 %v1566_v6 }
 0x3a8   :  { %526 = vmatprep.subr.bf16.mxu0 %v1572_v7 }
 0x3ab   :  { %527 = vmatpush1.bf16.msra.mxu0 %v1578_v8 }
 0x3ac   :  { %528 = vmatprep.subr.bf16.mxu0 %v1584_v9 }
 0x3af   :  { %529 = vmatpush1.bf16.msra.mxu0 %v1590_v10 }
 0x3b0   :  { %530 = vmatprep.subr.bf16.mxu0 %v1596_v11 }
 0x3b3   :  { %531 = vmatpush1.bf16.msra.mxu0 %v1602_v12 }
 0x3b4   :  { %532 = vmatprep.subr.bf16.mxu0 %v1608_v13 }
 0x3b7   :  { %533 = vmatpush1.bf16.msra.mxu0 %v1614_v14 }
 0x3b8   :  { %534 = vmatprep.subr.bf16.mxu0 %v1620_v15 }
 0x3bb   :  { %535 = vmatpush1.bf16.msra.mxu0 %v1626_v16 }
 0x3bc   :  { %630 = vmatprep.subr.bf16.mxu0 %v1536_v0 }
 0x45e   :  { %v444_v51 = vpop.f32.mrf.mxu0 }
 0x45f   :  { %v451_v52 = vadd.f32 %v1111_v50, %v444_v51 }
 0x460   :  { %v446_v53 = vpop.f32.mrf.mxu0 }
 0x461   :  { %v1114_v54 = vmul.f32 -1.442695, %v451_v52  ;;  %v452_v63 = vadd.f32 %v1112_v62, %v446_v53 }
 0x462   :  { %v448_v55 = vpop.f32.mrf.mxu0 }
 0x463   :  { %1434 = vpow2.f32 %v1114_v54  ;;  %v1115_v17 = vmul.f32 -1.442695, %v452_v63  ;;  %v1118_v54 = vld [vmem:[%s2092_s0 + $0x50] sm:$0xff] }
 0x464   :  { %v449_v56 = vpop.f32.mrf.mxu0 }
 0x470   :  { %v1435_v57 = vpop.eup %1434 }
 0x471   :  { %v459_v58 = vadd.f32 1.0, %v1435_v57 }
 0x473   :  { %1436 = vrcp.f32 %v459_v58 }
 0x474   :  { %1438 = vpow2.f32 %v1115_v17 }
 0x480   :  { %v1437_v59 = vpop.eup %1436 }
 0x481   :  { %v465_v60 = vmul.f32 %v1437_v59, %v1796_v48  ;;  %v1439_v18 = vpop.eup %1438  ;;  %v1119_v59 = vld [vmem:[%s2092_s0 + $0x58] sm:$0xff] }
 0x482   :  { %v460_v28 = vadd.f32 1.0, %v1439_v18 }
 0x483   :  { %v466_v61 = vpack.c.bf16 %v465_v60, %v465_v60 }
 0x484   :  { %1440 = vrcp.f32 %v460_v28 }
 0x485   :  { %1276 = vmatmul.mubr.bf16.vlgmr.msra.gmra.mxu1 %v466_v61 }
 0x486   :  { %1280 = vmatpush3.bf16.msra.mxu1 %v1658_v19  ;;  %1295 = vmatprep.mubr.msk.bf16.mxu1 %vm1502_vm0, %v1501_v20 }
 0x487   :  { %1281 = vmatprep.subr.bf16.mxu1 %v1501_v20 }
 0x48a   :  { %1282 = vmatpush3.bf16.msra.mxu1 %v1666_v21 }
 0x48b   :  { %1283 = vmatprep.subr.bf16.mxu1 %v1501_v20 }
 0x48e   :  { %1284 = vmatpush3.bf16.msra.mxu1 %v1673_v22 }
 0x48f   :  { %1285 = vmatprep.subr.bf16.mxu1 %v1501_v20 }
 0x491   :  { %v1441_v35 = vpop.eup %1440 }
 0x492   :  { %1286 = vmatpush3.bf16.msra.mxu1 %v1680_v23  ;;  %v510_v36 = vsub.f32 1.0, %v1441_v35  ;;  %v509_v38 = vmul.f32 %v1441_v35, %v1796_v48 }
 0x493   :  { %1287 = vmatprep.subr.bf16.mxu1 %v1501_v20 }
 0x496   :  { %1288 = vmatpush3.bf16.msra.mxu1 %v1687_v24 }
 0x497   :  { %1289 = vmatprep.subr.bf16.mxu1 %v1501_v20 }
 0x49a   :  { %1290 = vmatpush3.bf16.msra.mxu1 %v1693_v25 }
 0x49b   :  { %1291 = vmatprep.subr.bf16.mxu1 %v1501_v20 }
 0x49e   :  { %1292 = vmatpush3.bf16.msra.mxu1 %v1702_v26 }
 0x49f   :  { %1293 = vmatprep.subr.bf16.mxu1 %v1501_v20 }
 0x4a2   :  { %1294 = vmatpush3.bf16.msra.mxu1 %v1709_v27 }
 0x4a3   :  { %1299 = vmatprep.subr.bf16.mxu1 %v1501_v20 }
 0x545   :  { %v501_v30 = vpop.f32.mrf.mxu1 }
 0x546   :  { %v507_v31 = vadd.f32 %v1113_v29, %v501_v30 }
 0x547   :  { %v1277_v32 = vpop.f32.mrf.mxu1 }
 0x548   :  { %1442 = vtanh.f32 %v507_v31 }
 0x549   :  { %v504_v33 = vpop.f32.mrf.mxu1 }
 0x54b   :  { %v1278_v34 = vpop.f32.mrf.mxu1 }
 0x54c   :  { %v1123_v34 = vld [vmem:[%s2092_s0 + $0x60] sm:$0xff] }
 0x555   :  { %v1443_v37 = vpop.eup %1442 }
 0x556   :  { %v511_v39 = vmul.f32 %v1443_v37, %v510_v36 }
 0x558   :  { %v1849_v40 = vadd.f32 %v511_v39, %v509_v38 }
 0x55a   :  { %v513_v41 = vpack.c.bf16 %v1849_v40, %v1849_v40 }
 0x55c   :  { %1116 = vst [vmem:[%s2093_s4 + $0x8] sm:$0xf] %v513_v41  ;;  %553 = vmatmul.mubr.bf16.vlgmr.msra.gmra.mxu0 %v513_v41 }
 0x55d   :  { %631 = vmatpush1.bf16.msra.mxu0 %v1542_v2  ;;  %662 = vmatprep.mubr.bf16.mxu0 %v1500_v1 }
 0x55e   :  { %632 = vmatprep.subr.bf16.mxu0 %v1548_v3 }
 0x561   :  { %633 = vmatpush1.bf16.msra.mxu0 %v1554_v4 }
 0x562   :  { %634 = vmatprep.subr.bf16.mxu0 %v1560_v5 }
 0x565   :  { %635 = vmatpush1.bf16.msra.mxu0 %v1566_v6 }
 0x566   :  { %636 = vmatprep.subr.bf16.mxu0 %v1572_v7 }
 0x569   :  { %637 = vmatpush1.bf16.msra.mxu0 %v1578_v8 }
 0x56a   :  { %638 = vmatprep.subr.bf16.mxu0 %v1584_v9 }
 0x56d   :  { %639 = vmatpush1.bf16.msra.mxu0 %v1590_v10 }
 0x56e   :  { %640 = vmatprep.subr.bf16.mxu0 %v1596_v11 }
 0x571   :  { %641 = vmatpush1.bf16.msra.mxu0 %v1602_v12 }
 0x572   :  { %642 = vmatprep.subr.bf16.mxu0 %v1608_v13 }
 0x575   :  { %643 = vmatpush1.bf16.msra.mxu0 %v1614_v14 }
 0x576   :  { %644 = vmatprep.subr.bf16.mxu0 %v1620_v15 }
 0x579   :  { %645 = vmatpush1.bf16.msra.mxu0 %v1626_v16 }
 0x57a   :  { %740 = vmatprep.subr.bf16.mxu0 %v1536_v0 }
 0x61c   :  { %v554_v43 = vpop.f32.mrf.mxu0 }
 0x61d   :  { %v561_v44 = vadd.f32 %v1117_v42, %v554_v43 }
 0x61e   :  { %v556_v45 = vpop.f32.mrf.mxu0 }
 0x61f   :  { %v1120_v46 = vmul.f32 -1.442695, %v561_v44  ;;  %v562_v55 = vadd.f32 %v1118_v54, %v556_v45 }
 0x620   :  { %v558_v47 = vpop.f32.mrf.mxu0 }
 0x621   :  { %1444 = vpow2.f32 %v1120_v46  ;;  %v1121_v56 = vmul.f32 -1.442695, %v562_v55  ;;  %v1124_v46 = vld [vmem:[%s2092_s0 + $0x68] sm:$0xff] }
 0x622   :  { %v559_v48 = vpop.f32.mrf.mxu0 }
 0x62e   :  { %v1445_v49 = vpop.eup %1444 }
 0x62f   :  { %v569_v50 = vadd.f32 1.0, %v1445_v49 }
 0x631   :  { %1446 = vrcp.f32 %v569_v50 }
 0x632   :  { %1448 = vpow2.f32 %v1121_v56 }
 0x63e   :  { %v1447_v51 = vpop.eup %1446 }
 0x63f   :  { %v575_v52 = vmul.f32 %v1447_v51, %v1849_v40  ;;  %v1449_v57 = vpop.eup %1448  ;;  %v1125_v51 = vld [vmem:[%s2092_s0 + $0x70] sm:$0xff] }
 0x640   :  { %v570_v58 = vadd.f32 1.0, %v1449_v57 }
 0x641   :  { %v576_v53 = vpack.c.bf16 %v575_v52, %v575_v52 }
 0x642   :  { %1450 = vrcp.f32 %v570_v58 }
 0x643   :  { %1296 = vmatmul.mubr.bf16.vlgmr.msra.gmra.mxu1 %v576_v53 }
 0x644   :  { %1300 = vmatpush3.bf16.msra.mxu1 %v1658_v19  ;;  %1315 = vmatprep.mubr.msk.bf16.mxu1 %vm1502_vm0, %v1501_v20 }
 0x645   :  { %1301 = vmatprep.subr.bf16.mxu1 %v1501_v20 }
 0x648   :  { %1302 = vmatpush3.bf16.msra.mxu1 %v1666_v21 }
 0x649   :  { %1303 = vmatprep.subr.bf16.mxu1 %v1501_v20 }
 0x64c   :  { %1304 = vmatpush3.bf16.msra.mxu1 %v1673_v22 }
 0x64d   :  { %1305 = vmatprep.subr.bf16.mxu1 %v1501_v20 }
 0x64f   :  { %v1451_v18 = vpop.eup %1450 }
 0x650   :  { %1306 = vmatpush3.bf16.msra.mxu1 %v1680_v23  ;;  %v620_v28 = vsub.f32 1.0, %v1451_v18  ;;  %v619_v30 = vmul.f32 %v1451_v18, %v1849_v40 }
 0x651   :  { %1307 = vmatprep.subr.bf16.mxu1 %v1501_v20 }
 0x654   :  { %1308 = vmatpush3.bf16.msra.mxu1 %v1687_v24 }
 0x655   :  { %1309 = vmatprep.subr.bf16.mxu1 %v1501_v20 }
 0x658   :  { %1310 = vmatpush3.bf16.msra.mxu1 %v1693_v25 }
 0x659   :  { %1311 = vmatprep.subr.bf16.mxu1 %v1501_v20 }
 0x65c   :  { %1312 = vmatpush3.bf16.msra.mxu1 %v1702_v26 }
 0x65d   :  { %1313 = vmatprep.subr.bf16.mxu1 %v1501_v20 }
 0x660   :  { %1314 = vmatpush3.bf16.msra.mxu1 %v1709_v27 }
 0x661   :  { %1319 = vmatprep.subr.bf16.mxu1 %v1501_v20 }
 0x703   :  { %v611_v60 = vpop.f32.mrf.mxu1 }
 0x704   :  { %v617_v61 = vadd.f32 %v1119_v59, %v611_v60 }
 0x705   :  { %v1297_v62 = vpop.f32.mrf.mxu1 }
 0x706   :  { %1452 = vtanh.f32 %v617_v61 }
 0x707   :  { %v614_v63 = vpop.f32.mrf.mxu1 }
 0x709   :  { %v1298_v17 = vpop.f32.mrf.mxu1 }
 0x713   :  { %v1453_v29 = vpop.eup %1452 }
 0x714   :  { %v621_v31 = vmul.f32 %v1453_v29, %v620_v28 }
 0x716   :  { %v1902_v32 = vadd.f32 %v621_v31, %v619_v30 }
 0x718   :  { %v623_v33 = vpack.c.bf16 %v1902_v32, %v1902_v32 }
 0x71a   :  { %1122 = vst [vmem:[%s2093_s4 + $0xc] sm:$0xf] %v623_v33  ;;  %663 = vmatmul.mubr.bf16.vlgmr.msra.gmra.mxu0 %v623_v33 }
 0x71b   :  { %741 = vmatpush1.bf16.msra.mxu0 %v1542_v2  ;;  %772 = vmatprep.mubr.bf16.mxu0 %v1500_v1 }
 0x71c   :  { %742 = vmatprep.subr.bf16.mxu0 %v1548_v3 }
 0x71f   :  { %743 = vmatpush1.bf16.msra.mxu0 %v1554_v4 }
 0x720   :  { %744 = vmatprep.subr.bf16.mxu0 %v1560_v5 }
 0x723   :  { %745 = vmatpush1.bf16.msra.mxu0 %v1566_v6 }
 0x724   :  { %746 = vmatprep.subr.bf16.mxu0 %v1572_v7 }
 0x727   :  { %747 = vmatpush1.bf16.msra.mxu0 %v1578_v8 }
 0x728   :  { %748 = vmatprep.subr.bf16.mxu0 %v1584_v9 }
 0x72b   :  { %749 = vmatpush1.bf16.msra.mxu0 %v1590_v10 }
 0x72c   :  { %750 = vmatprep.subr.bf16.mxu0 %v1596_v11 }
 0x72f   :  { %751 = vmatpush1.bf16.msra.mxu0 %v1602_v12 }
 0x730   :  { %752 = vmatprep.subr.bf16.mxu0 %v1608_v13 }
 0x733   :  { %753 = vmatpush1.bf16.msra.mxu0 %v1614_v14 }
 0x734   :  { %754 = vmatprep.subr.bf16.mxu0 %v1620_v15 }
 0x737   :  { %755 = vmatpush1.bf16.msra.mxu0 %v1626_v16 }
 0x738   :  { %850 = vmatprep.subr.bf16.mxu0 %v1536_v0 }
 0x7da   :  { %v664_v35 = vpop.f32.mrf.mxu0 }
 0x7db   :  { %v671_v36 = vadd.f32 %v1123_v34, %v664_v35 }
 0x7dc   :  { %v666_v37 = vpop.f32.mrf.mxu0 }
 0x7dd   :  { %v1126_v38 = vmul.f32 -1.442695, %v671_v36  ;;  %v672_v47 = vadd.f32 %v1124_v46, %v666_v37  ;;  %v1131_v36 = vld [vmem:[%s2092_s0 + $0x88] sm:$0xff] }
 0x7de   :  { %v668_v39 = vpop.f32.mrf.mxu0 }
 0x7df   :  { %1454 = vpow2.f32 %v1126_v38  ;;  %v1127_v48 = vmul.f32 -1.442695, %v672_v47 }
 0x7e0   :  { %v669_v40 = vpop.f32.mrf.mxu0 }
 0x7ec   :  { %v1455_v41 = vpop.eup %1454 }
 0x7ed   :  { %v679_v42 = vadd.f32 1.0, %v1455_v41 }
 0x7ef   :  { %1456 = vrcp.f32 %v679_v42 }
 0x7f0   :  { %1458 = vpow2.f32 %v1127_v48 }
 0x7fc   :  { %v1457_v43 = vpop.eup %1456 }
 0x7fd   :  { %v685_v44 = vmul.f32 %v1457_v43, %v1902_v32  ;;  %v1459_v49 = vpop.eup %1458 }
 0x7fe   :  { %v680_v50 = vadd.f32 1.0, %v1459_v49  ;;  %v1494_v49 = vld [vmem:[%s2089_s2 + $0x70] ss:$8 sps:$4 sm:$0xff]  }
 0x7ff   :  { %v686_v45 = vpack.c.bf16 %v685_v44, %v685_v44 }
 0x800   :  { %1460 = vrcp.f32 %v680_v50  ;;  %v1495_v50 = vld [vmem:[%s2089_s2 + $0x64] ss:$8 sps:$4 sm:$0xff]  }
 0x801   :  { %1316 = vmatmul.mubr.bf16.vlgmr.msra.gmra.mxu1 %v686_v45 }
 0x802   :  { %1320 = vmatpush3.bf16.msra.mxu1 %v1658_v19  ;;  %1335 = vmatprep.mubr.msk.bf16.mxu1 %vm1502_vm0, %v1501_v20 }
 0x803   :  { %1321 = vmatprep.subr.bf16.mxu1 %v1501_v20 }
 0x806   :  { %1322 = vmatpush3.bf16.msra.mxu1 %v1666_v21 }
 0x807   :  { %1323 = vmatprep.subr.bf16.mxu1 %v1501_v20 }
 0x80a   :  { %1324 = vmatpush3.bf16.msra.mxu1 %v1673_v22 }
 0x80b   :  { %1325 = vmatprep.subr.bf16.mxu1 %v1501_v20 }
 0x80d   :  { %v1461_v57 = vpop.eup %1460 }
 0x80e   :  { %1326 = vmatpush3.bf16.msra.mxu1 %v1680_v23  ;;  %v730_v58 = vsub.f32 1.0, %v1461_v57  ;;  %v729_v60 = vmul.f32 %v1461_v57, %v1902_v32 }
 0x80f   :  { %1327 = vmatprep.subr.bf16.mxu1 %v1501_v20 }
 0x812   :  { %1328 = vmatpush3.bf16.msra.mxu1 %v1687_v24 }
 0x813   :  { %1329 = vmatprep.subr.bf16.mxu1 %v1501_v20 }
 0x816   :  { %1330 = vmatpush3.bf16.msra.mxu1 %v1693_v25 }
 0x817   :  { %1331 = vmatprep.subr.bf16.mxu1 %v1501_v20 }
 0x81a   :  { %1332 = vmatpush3.bf16.msra.mxu1 %v1702_v26 }
 0x81b   :  { %1333 = vmatprep.subr.bf16.mxu1 %v1501_v20 }
 0x81e   :  { %1334 = vmatpush3.bf16.msra.mxu1 %v1709_v27 }
 0x81f   :  { %1339 = vmatprep.subr.bf16.mxu1 %v1501_v20 }
 0x8c1   :  { %v721_v52 = vpop.f32.mrf.mxu1 }
 0x8c2   :  { %v727_v53 = vadd.f32 %v1125_v51, %v721_v52  ;;  %v1496_v51 = vld [vmem:[%s2089_s2 + $0x60] ss:$8 sps:$4 sm:$0xff]   ;;  %v1497_v52 = vld [vmem:[%s2089_s2 + $0x54] ss:$8 sps:$4 sm:$0xff]  }
 0x8c3   :  { %v1317_v54 = vpop.f32.mrf.mxu1 }
 0x8c4   :  { %1462 = vtanh.f32 %v727_v53  ;;  %v1498_v53 = vld [vmem:[%s2089_s2 + $0x50] ss:$8 sps:$4 sm:$0xff]  }
 0x8c5   :  { %v724_v55 = vpop.f32.mrf.mxu1 }
 0x8c7   :  { %v1318_v56 = vpop.f32.mrf.mxu1 }
 0x8d1   :  { %v1463_v59 = vpop.eup %1462 }
 0x8d2   :  { %v731_v61 = vmul.f32 %v1463_v59, %v730_v58 }
 0x8d4   :  { %v1955_v62 = vadd.f32 %v731_v61, %v729_v60 }
 0x8d6   :  { %v733_v63 = vpack.c.bf16 %v1955_v62, %v1955_v62 }
 0x8d8   :  { %1128 = vst [vmem:[%s2093_s4 + $0x10] sm:$0xf] %v733_v63  ;;  %773 = vmatmul.mubr.bf16.vlgmr.msra.gmra.mxu0 %v733_v63 }
 0x8d9   :  { %851 = vmatpush1.bf16.msra.mxu0 %v1542_v2  ;;  %882 = vmatprep.mubr.bf16.mxu0 %v1500_v1  ;;  %v1129_v2 = vld [vmem:[%s2092_s0 + $0x78] sm:$0xff] }
 0x8da   :  { %852 = vmatprep.subr.bf16.mxu0 %v1548_v3 }
 0x8dd   :  { %853 = vmatpush1.bf16.msra.mxu0 %v1554_v4 }
 0x8de   :  { %854 = vmatprep.subr.bf16.mxu0 %v1560_v5 }
 0x8e1   :  { %855 = vmatpush1.bf16.msra.mxu0 %v1566_v6 }
 0x8e2   :  { %856 = vmatprep.subr.bf16.mxu0 %v1572_v7 }
 0x8e5   :  { %857 = vmatpush1.bf16.msra.mxu0 %v1578_v8 }
 0x8e6   :  { %858 = vmatprep.subr.bf16.mxu0 %v1584_v9 }
 0x8e9   :  { %859 = vmatpush1.bf16.msra.mxu0 %v1590_v10 }
 0x8ea   :  { %860 = vmatprep.subr.bf16.mxu0 %v1596_v11 }
 0x8ed   :  { %861 = vmatpush1.bf16.msra.mxu0 %v1602_v12 }
 0x8ee   :  { %862 = vmatprep.subr.bf16.mxu0 %v1608_v13 }
 0x8f1   :  { %863 = vmatpush1.bf16.msra.mxu0 %v1614_v14 }
 0x8f2   :  { %864 = vmatprep.subr.bf16.mxu0 %v1620_v15 }
 0x8f5   :  { %865 = vmatpush1.bf16.msra.mxu0 %v1626_v16 }
 0x8f6   :  { %960 = vmatprep.subr.bf16.mxu0 %v1536_v0  ;;  %v1130_v0 = vld [vmem:[%s2092_s0 + $0x80] sm:$0xff] }
 0x998   :  { %v774_v3 = vpop.f32.mrf.mxu0 }
 0x999   :  { %v781_v4 = vadd.f32 %v1129_v2, %v774_v3 }
 0x99a   :  { %v776_v5 = vpop.f32.mrf.mxu0 }
 0x99b   :  { %v1132_v6 = vmul.f32 -1.442695, %v781_v4  ;;  %v782_v32 = vadd.f32 %v1130_v0, %v776_v5  ;;  %v1141_v4 = vld [vmem:[%s2092_s0 + $0xa8] sm:$0xff] }
 0x99c   :  { %v778_v7 = vpop.f32.mrf.mxu0 }
 0x99d   :  { %1464 = vpow2.f32 %v1132_v6  ;;  %v1133_v33 = vmul.f32 -1.442695, %v782_v32 }
 0x99e   :  { %v779_v17 = vpop.f32.mrf.mxu0 }
 0x9aa   :  { %v1465_v18 = vpop.eup %1464 }
 0x9ab   :  { %v789_v28 = vadd.f32 1.0, %v1465_v18 }
 0x9ad   :  { %1466 = vrcp.f32 %v789_v28 }
 0x9ae   :  { %1468 = vpow2.f32 %v1133_v33  ;;  %v1142_v33 = vld [vmem:[%s2092_s0 + $0xb0] sm:$0xff] }
 0x9ba   :  { %v1467_v29 = vpop.eup %1466 }
 0x9bb   :  { %v795_v30 = vmul.f32 %v1467_v29, %v1955_v62  ;;  %v1469_v34 = vpop.eup %1468 }
 0x9bc   :  { %v790_v35 = vadd.f32 1.0, %v1469_v34 }
 0x9bd   :  { %v796_v31 = vpack.c.bf16 %v795_v30, %v795_v30 }
 0x9be   :  { %1470 = vrcp.f32 %v790_v35 }
 0x9bf   :  { %1336 = vmatmul.mubr.bf16.vlgmr.msra.gmra.mxu1 %v796_v31 }
 0x9c0   :  { %1340 = vmatpush3.bf16.msra.mxu1 %v1658_v19  ;;  %1355 = vmatprep.mubr.msk.bf16.mxu1 %vm1502_vm0, %v1501_v20 }
 0x9c1   :  { %1341 = vmatprep.subr.bf16.mxu1 %v1501_v20 }
 0x9c4   :  { %1342 = vmatpush3.bf16.msra.mxu1 %v1666_v21 }
 0x9c5   :  { %1343 = vmatprep.subr.bf16.mxu1 %v1501_v20 }
 0x9c8   :  { %1344 = vmatpush3.bf16.msra.mxu1 %v1673_v22 }
 0x9c9   :  { %1345 = vmatprep.subr.bf16.mxu1 %v1501_v20 }
 0x9cb   :  { %v1471_v42 = vpop.eup %1470 }
 0x9cc   :  { %1346 = vmatpush3.bf16.msra.mxu1 %v1680_v23  ;;  %v840_v43 = vsub.f32 1.0, %v1471_v42  ;;  %v839_v45 = vmul.f32 %v1471_v42, %v1955_v62 }
 0x9cd   :  { %1347 = vmatprep.subr.bf16.mxu1 %v1501_v20 }
 0x9d0   :  { %1348 = vmatpush3.bf16.msra.mxu1 %v1687_v24 }
 0x9d1   :  { %1349 = vmatprep.subr.bf16.mxu1 %v1501_v20 }
 0x9d4   :  { %1350 = vmatpush3.bf16.msra.mxu1 %v1693_v25 }
 0x9d5   :  { %1351 = vmatprep.subr.bf16.mxu1 %v1501_v20 }
 0x9d8   :  { %1352 = vmatpush3.bf16.msra.mxu1 %v1702_v26 }
 0x9d9   :  { %1353 = vmatprep.subr.bf16.mxu1 %v1501_v20 }
 0x9dc   :  { %1354 = vmatpush3.bf16.msra.mxu1 %v1709_v27 }
 0x9dd   :  { %1359 = vmatprep.subr.bf16.mxu1 %v1501_v20 }
 0xa7f   :  { %v831_v37 = vpop.f32.mrf.mxu1 }
 0xa80   :  { %v837_v38 = vadd.f32 %v1131_v36, %v831_v37 }
 0xa81   :  { %v1337_v39 = vpop.f32.mrf.mxu1 }
 0xa82   :  { %1472 = vtanh.f32 %v837_v38  ;;  %v1143_v38 = vld [vmem:[%s2092_s0 + $0xb8] sm:$0xff] }
 0xa83   :  { %v834_v40 = vpop.f32.mrf.mxu1 }
 0xa85   :  { %v1338_v41 = vpop.f32.mrf.mxu1 }
 0xa8f   :  { %v1473_v44 = vpop.eup %1472 }
 0xa90   :  { %v841_v46 = vmul.f32 %v1473_v44, %v840_v43 }
 0xa92   :  { %v2008_v47 = vadd.f32 %v841_v46, %v839_v45 }
 0xa94   :  { %v843_v48 = vpack.c.bf16 %v2008_v47, %v2008_v47 }
 0xa96   :  { %1134 = vst [vmem:[%s2093_s4 + $0x14] sm:$0xf] %v843_v48  ;;  %883 = vmatmul.mubr.bf16.vlgmr.msra.gmra.mxu0 %v843_v48 }
 0xa97   :  { %961 = vmatpush1.bf16.msra.mxu0 %v1494_v49  ;;  %992 = vmatprep.mubr.bf16.mxu0 %v1500_v1  ;;  %v1499_v1 = vld [vmem:[%s2089_s2 + $0x44] ss:$8 sps:$4 sm:$0xff]  }
 0xa98   :  { %962 = vmatprep.subr.bf16.mxu0 %v1495_v50 }
 0xa9b   :  { %963 = vmatpush1.bf16.msra.mxu0 %v1496_v51 }
 0xa9c   :  { %964 = vmatprep.subr.bf16.mxu0 %v1497_v52 }
 0xa9f   :  { %965 = vmatpush1.bf16.msra.mxu0 %v1498_v53 }
 0xaa0   :  { %966 = vmatprep.subr.bf16.mxu0 %v1499_v1 }
 0xaa3   :  { %967 = vmatpush1.bf16.msra.mxu0 %v1578_v8  ;;  %v1135_v8 = vld [vmem:[%s2092_s0 + $0x90] sm:$0xff] }
 0xaa4   :  { %968 = vmatprep.subr.bf16.mxu0 %v1584_v9 }
 0xaa7   :  { %969 = vmatpush1.bf16.msra.mxu0 %v1590_v10 }
 0xaa8   :  { %970 = vmatprep.subr.bf16.mxu0 %v1596_v11 }
 0xaab   :  { %971 = vmatpush1.bf16.msra.mxu0 %v1602_v12 }
 0xaac   :  { %972 = vmatprep.subr.bf16.mxu0 %v1608_v13 }
 0xaaf   :  { %973 = vmatpush1.bf16.msra.mxu0 %v1614_v14 }
 0xab0   :  { %974 = vmatprep.subr.bf16.mxu0 %v1620_v15 }
 0xab3   :  { %975 = vmatpush1.bf16.msra.mxu0 %v1626_v16  ;;  %v1136_v16 = vld [vmem:[%s2092_s0 + $0x98] sm:$0xff] }
 0xb56   :  { %v884_v54 = vpop.f32.mrf.mxu0 }
 0xb57   :  { %v891_v9 = vadd.f32 %v1135_v8, %v884_v54 }
 0xb58   :  { %v886_v55 = vpop.f32.mrf.mxu0 }
 0xb59   :  { %v1138_v10 = vmul.f32 -1.442695, %v891_v9 }
 0xb5a   :  { %v888_v56 = vpop.f32.mrf.mxu0 }
 0xb5b   :  { %1474 = vpow2.f32 %v1138_v10 }
 0xb5c   :  { %v889_v11 = vpop.f32.mrf.mxu0 }
 0xb68   :  { %v1475_v12 = vpop.eup %1474 }
 0xb69   :  { %v899_v57 = vadd.f32 1.0, %v1475_v12 }
 0xb6b   :  { %1476 = vrcp.f32 %v899_v57 }
 0xb78   :  { %v1477_v13 = vpop.eup %1476 }
 0xb79   :  { %v905_v14 = vmul.f32 %v1477_v13, %v2008_v47 }
 0xb7b   :  { %v906_v15 = vpack.c.bf16 %v905_v14, %v905_v14 }
 0xb7d   :  { %1356 = vmatmul.mubr.bf16.vlgmr.msra.gmra.mxu1 %v906_v15 }
 0xb7e   :  { %1360 = vmatpush3.bf16.msra.mxu1 %v1658_v19  ;;  %1375 = vmatprep.mubr.msk.bf16.mxu1 %vm1502_vm0, %v1501_v20  ;;  %v892_v19 = vadd.f32 %v1136_v16, %v886_v55 }
 0xb7f   :  { %1361 = vmatprep.subr.bf16.mxu1 %v1501_v20 }
 0xb82   :  { %1362 = vmatpush3.bf16.msra.mxu1 %v1666_v21  ;;  %v1139_v21 = vmul.f32 -1.442695, %v892_v19 }
 0xb83   :  { %1363 = vmatprep.subr.bf16.mxu1 %v1501_v20 }
 0xb84   :  { %1478 = vpow2.f32 %v1139_v21 }
 0xb86   :  { %1364 = vmatpush3.bf16.msra.mxu1 %v1673_v22 }
 0xb87   :  { %1365 = vmatprep.subr.bf16.mxu1 %v1501_v20 }
 0xb8a   :  { %1366 = vmatpush3.bf16.msra.mxu1 %v1680_v23 }
 0xb8b   :  { %1367 = vmatprep.subr.bf16.mxu1 %v1501_v20 }
 0xb8e   :  { %1368 = vmatpush3.bf16.msra.mxu1 %v1687_v24  ;;  %v1137_v24 = vld [vmem:[%s2092_s0 + $0xa0] sm:$0xff] }
 0xb8f   :  { %1369 = vmatprep.subr.bf16.mxu1 %v1501_v20 }
 0xb91   :  { %v1479_v22 = vpop.eup %1478 }
 0xb92   :  { %1370 = vmatpush3.bf16.msra.mxu1 %v1693_v25  ;;  %v900_v23 = vadd.f32 1.0, %v1479_v22 }
 0xb93   :  { %1371 = vmatprep.subr.bf16.mxu1 %v1501_v20 }
 0xb94   :  { %1480 = vrcp.f32 %v900_v23 }
 0xb96   :  { %1372 = vmatpush3.bf16.msra.mxu1 %v1702_v26 }
 0xb97   :  { %1373 = vmatprep.subr.bf16.mxu1 %v1501_v20 }
 0xb9a   :  { %1374 = vmatpush3.bf16.msra.mxu1 %v1709_v27 }
 0xba1   :  { %v1481_v59 = vpop.eup %1480 }
 0xba2   :  { %v950_v60 = vsub.f32 1.0, %v1481_v59  ;;  %v949_v62 = vmul.f32 %v1481_v59, %v2008_v47 }
 0xc3d   :  { %v941_v25 = vpop.f32.mrf.mxu1 }
 0xc3e   :  { %v947_v26 = vadd.f32 %v1137_v24, %v941_v25 }
 0xc3f   :  { %v1357_v58 = vpop.f32.mrf.mxu1 }
 0xc40   :  { %1482 = vtanh.f32 %v947_v26 }
 0xc41   :  { %v944_v20 = vpop.f32.mrf.mxu1 }
 0xc43   :  { %v1358_v27 = vpop.f32.mrf.mxu1 }
 0xc4d   :  { %v1483_v61 = vpop.eup %1482 }
 0xc4e   :  { %v951_v63 = vmul.f32 %v1483_v61, %v950_v60 }
 0xc50   :  { %v952_v2 = vadd.f32 %v951_v63, %v949_v62 }
 0xc52   :  { %v953_v3 = vpack.c.bf16 %v952_v2, %v952_v2 }
 0xc54   :  { %1140 = vst [vmem:[%s2093_s4 + $0x18] sm:$0xf] %v953_v3  ;;  %993 = vmatmul.mubr.bf16.vlgmr.msra.gmra.mxu0 %v953_v3 }
 0xd14   :  { %v994_v5 = vpop.f32.mrf.mxu0 }
 0xd15   :  { %v1001_v6 = vadd.f32 %v1141_v4, %v994_v5 }
 0xd16   :  { %v996_v7 = vpop.f32.mrf.mxu0 }
 0xd17   :  { %v1144_v17 = vmul.f32 -1.442695, %v1001_v6  ;;  %v1002_v34 = vadd.f32 %v1142_v33, %v996_v7 }
 0xd18   :  { %v998_v18 = vpop.f32.mrf.mxu0 }
 0xd19   :  { %1484 = vpow2.f32 %v1144_v17  ;;  %v1145_v35 = vmul.f32 -1.442695, %v1002_v34 }
 0xd1a   :  { %v999_v28 = vpop.f32.mrf.mxu0 }
 0xd26   :  { %v1485_v29 = vpop.eup %1484 }
 0xd27   :  { %v1009_v30 = vadd.f32 1.0, %v1485_v29 }
 0xd29   :  { %1486 = vrcp.f32 %v1009_v30 }
 0xd2a   :  { %1488 = vpow2.f32 %v1145_v35 }
 0xd36   :  { %v1487_v31 = vpop.eup %1486 }
 0xd37   :  { %v1015_v0 = vmul.f32 %v1487_v31, %v952_v2  ;;  %v1489_v36 = vpop.eup %1488 }
 0xd38   :  { %v1010_v37 = vadd.f32 1.0, %v1489_v36 }
 0xd39   :  { %v1016_v32 = vpack.c.bf16 %v1015_v0, %v1015_v0 }
 0xd3a   :  { %1490 = vrcp.f32 %v1010_v37 }
 0xd3b   :  { %1376 = vmatmul.mubr.bf16.vlgmr.msra.gmra.mxu1 %v1016_v32 }
 0xd47   :  { %v1491_v44 = vpop.eup %1490 }
 0xd48   :  { %v1060_v45 = vsub.f32 1.0, %v1491_v44  ;;  %v1059_v47 = vmul.f32 %v1491_v44, %v952_v2 }
 0xdfb   :  { %v1051_v39 = vpop.f32.mrf.mxu1 }
 0xdfc   :  { %v1057_v40 = vadd.f32 %v1143_v38, %v1051_v39 }
 0xdfd   :  { %v1377_v41 = vpop.f32.mrf.mxu1 }
 0xdfe   :  { %1492 = vtanh.f32 %v1057_v40 }
 0xdff   :  { %v1054_v42 = vpop.f32.mrf.mxu1 }
 0xe01   :  { %v1378_v43 = vpop.f32.mrf.mxu1 }
 0xe0b   :  { %v1493_v46 = vpop.eup %1492 }
 0xe0c   :  { %v1061_v48 = vmul.f32 %v1493_v46, %v1060_v45 }
 0xe0e   :  { %v1062_v49 = vadd.f32 %v1061_v48, %v1059_v47 }
 0xe10   :  { %v1063_v50 = vpack.c.bf16 %v1062_v49, %v1062_v49  ;;  %1070 = vst [vmem:[%s2094_s5] sm:$0xff] %v1062_v49 }
 0xe12   :  { %1146 = vst [vmem:[%s2093_s4 + $0x1c] sm:$0xf] %v1063_v50 }

</bundles_post_ra>
